<compile_context>
chip_gen: v7x
topology: tpu7x:2x2x1
jax: 0.10.0
libtpu: 0.0.40
codegen_flags: <defaults>
</compile_context>

<pallas_src>
import jax
import jax.numpy as jnp
import numpy as np
from jax.experimental import pallas as pl
from jax.experimental.pallas import tpu as pltpu

# ---- module hyper-parameters (small, consistent with __init__) ----
DIM = 32
DIM_HEAD = 16
HEADS = DIM // DIM_HEAD
NUM_TYPES = 2
NUM_RELATIONS = NUM_TYPES ** 2
AGENT_SIZE = 3          # L
WINDOW = 4              # window_size (W1 == W2)
SCALE = DIM_HEAD ** -0.5


# --------------------------------------------------------------------------
# parameter construction (deterministic, synthetic — no checkpoint loading)
# --------------------------------------------------------------------------
def make_params(key):
    ks = jax.random.split(key, 8)

    def lin(k):
        kw, kb = jax.random.split(k)
        # stored as (in, out) so y = x @ W + b
        W = jax.random.normal(kw, (NUM_TYPES, DIM, DIM), jnp.float32) * 0.05
        b = jax.random.normal(kb, (NUM_TYPES, DIM), jnp.float32) * 0.05
        return W, b

    Wq, bq = lin(ks[0])
    Wk, bk = lin(ks[1])
    Wv, bv = lin(ks[2])
    Wa, ba = lin(ks[3])
    rel_att = jax.random.normal(
        ks[4], (NUM_RELATIONS, HEADS, DIM_HEAD, DIM_HEAD), jnp.float32) / np.sqrt(DIM_HEAD)
    rel_msg = jax.random.normal(
        ks[5], (NUM_RELATIONS, HEADS, DIM_HEAD, DIM_HEAD), jnp.float32) / np.sqrt(DIM_HEAD)
    bias_table = jax.random.normal(
        ks[6], ((2 * WINDOW - 1) * (2 * WINDOW - 1), HEADS), jnp.float32) * 0.1
    return dict(Wq=Wq, bq=bq, Wk=Wk, bk=bk, Wv=Wv, bv=bv, Wa=Wa, ba=ba,
                rel_att=rel_att, rel_msg=rel_msg, bias_table=bias_table)


def relative_position_index(Wh, Ww):
    coords = np.stack(np.meshgrid(np.arange(Wh), np.arange(Ww), indexing="ij"))
    cf = coords.reshape(2, -1)
    rel = cf[:, :, None] - cf[:, None, :]
    rel = np.transpose(rel, (1, 2, 0))
    idx = (rel[..., 0] + Wh - 1) * (2 * Wh - 1) + (rel[..., 1] + Ww - 1)
    return jnp.asarray(idx, jnp.int32)          # (Wh*Ww, Wh*Ww)


# --------------------------------------------------------------------------
# fused Pallas kernel: fused (relation-folded) QKV projection + window attention
# with the output projection pre-folded into V. One grid step per batch element.
# --------------------------------------------------------------------------
def _make_fused_kernel(L, XY, N, D, H, Dh, T):
    M = XY * N
    LN = L * N
    HD = H * D
    dn_nn = (((1,), (0,)), ((), ()))   # A @ B
    dn_nt = (((1,), (1,)), ((), ()))   # A @ B.T

    def kernel(types_ref, x_ref, wf_ref, bf_ref, bias_ref, ba_ref, o_ref,
               q_scr, kp_scr, vpp_scr):
        # types_ref: SMEM (B, L) int32 (scalar prefetch)
        # x_ref:     (1, L, M, D) bf16          current batch slab
        # wf_ref:    (T*T, D, 2D+H*D) bf16      fused [Q|K'|V''] weights (resident)
        # bf_ref:    (T*T, 1, 2D+H*D) f32       fused biases
        # bias_ref:  (H, N, L*N) f32            rel-pos bias, pre-tiled over agents
        # ba_ref:    (T, 1, D) f32              output-projection bias
        # o_ref:     (1, M, D) f32
        # q_scr:     VMEM (M, D)        bf16    agent-0 queries (scale folded into K')
        # kp_scr:    VMEM (XY, LN, D)   bf16    K' = K @ (scale*Watt)^T, window-major
        # vpp_scr:   VMEM (XY, LN, H*D) bf16    V'' = V @ Wmsg @ Wa[t0], window-major
        b = pl.program_id(0)
        t0 = types_ref[b, 0]

        # ---- phase 1: one fused (M,D)@(D,2D+HD) matmul per agent, scatter per window
        for l in range(L):
            rel = t0 * T + types_ref[b, l]
            qkv = jax.lax.dot_general(x_ref[0, l], wf_ref[rel], dn_nn,
                                      preferred_element_type=jnp.float32)
            qkv = (qkv + bf_ref[rel]).astype(kp_scr.dtype)      # (M, 2D+HD) bf16
            if l == 0:
                q_scr[...] = qkv[:, 0:D]                        # queries: agent 0 only
            kp_all = qkv[:, D:2 * D]                            # (M, D)
            vpp_all = qkv[:, 2 * D:2 * D + HD]                  # (M, H*D)
            for w in range(XY):
                kp_scr[w, l * N:(l + 1) * N, :] = kp_all[w * N:(w + 1) * N, :]
                vpp_scr[w, l * N:(l + 1) * N, :] = vpp_all[w * N:(w + 1) * N, :]

        ba_row = ba_ref[t0]                                     # (1, D) f32
        bias_h = [bias_ref[h] for h in range(H)]                # hoisted, (N, LN) f32

        # ---- phase 2: per window / per head attention; Wa already folded into V''
        for w in range(XY):
            q_w = q_scr[w * N:(w + 1) * N, :]                   # (N, D)  bf16
            kp_w = kp_scr[w]                                    # (LN, D) bf16
            vpp_w = vpp_scr[w]                                  # (LN, HD) bf16
            acc = None
            for h in range(H):
                s = jax.lax.dot_general(q_w[:, h * Dh:(h + 1) * Dh],
                                        kp_w[:, h * Dh:(h + 1) * Dh], dn_nt,
                                        preferred_element_type=jnp.float32)   # (N, LN)
                s = s + bias_h[h]
                m = s.max(axis=-1, keepdims=True)
                p = jnp.exp(s - m)
                inv = pl.reciprocal(p.sum(axis=-1, keepdims=True), approx=False)
                o_h = jax.lax.dot_general(p.astype(vpp_w.dtype),
                                          vpp_w[:, h * D:(h + 1) * D], dn_nn,
                                          preferred_element_type=jnp.float32)  # (N, D)
                o_h = o_h * inv
                acc = o_h if acc is None else acc + o_h
            o_ref[0, w * N:(w + 1) * N, :] = acc + ba_row

    return kernel


# --------------------------------------------------------------------------
# full forward: host-side weight folding (tiny) + the single fused kernel
# --------------------------------------------------------------------------
def hetero_attention_forward(x, types, params):
    B, L, X, Y, W1, W2, D = x.shape
    T, H, Dh = NUM_TYPES, HEADS, DIM_HEAD
    N = W1 * W2
    XY = X * Y
    M = XY * N
    R = T * T
    FW = 2 * D + H * D                                  # fused lane width (=128 here)

    types = types.astype(jnp.int32)                     # (B, L) -> SMEM via prefetch
    x_flat = x.reshape(B, L, M, D).astype(jnp.bfloat16)

    # ---- host-side folding of all per-type / per-relation weights (f32) ----
    t0_idx = jnp.repeat(jnp.arange(T), T)               # relation r = t0*T + t_l
    tl_idx = jnp.tile(jnp.arange(T), T)

    Wq, bq = params["Wq"], params["bq"]
    Wk, bk = params["Wk"], params["bk"]
    Wv, bv = params["Wv"], params["bv"]
    Wa, ba = params["Wa"], params["ba"]
    att_s = params["rel_att"] * SCALE                   # fold q*scale into relation_att
    msg = params["rel_msg"]

    # K' columns: Wk[t_l][:, h*Dh:(h+1)*Dh] @ (scale*Watt[r,h])^T
    Wk_h = Wk.reshape(T, D, H, Dh)[tl_idx]                                   # (R,D,H,Dh)
    WK = jnp.einsum("rdhp,rhqp->rdhq", Wk_h, att_s).reshape(R, D, D)
    bK = jnp.einsum("rhp,rhqp->rhq",
                    bk.reshape(T, H, Dh)[tl_idx], att_s).reshape(R, D)

    # V'' columns: Wv[t_l][:, h*Dh:(h+1)*Dh] @ Wmsg[r,h] @ Wa[t0][h*Dh:(h+1)*Dh, :]
    Wa_h = Wa.reshape(T, H, Dh, D)[t0_idx]                                   # (R,H,Dh,D)
    Wv_h = Wv.reshape(T, D, H, Dh)[tl_idx]
    WV = jnp.einsum("rdhp,rhpq,rhqe->rdhe", Wv_h, msg, Wa_h).reshape(R, D, H * D)
    bV = jnp.einsum("rhp,rhpq,rhqe->rhe",
                    bv.reshape(T, H, Dh)[tl_idx], msg, Wa_h).reshape(R, H * D)

    Wfused = jnp.concatenate([Wq[tl_idx], WK, WV], axis=-1).astype(jnp.bfloat16)  # (R,D,FW)
    bfused = jnp.concatenate([bq[tl_idx], bK, bV], axis=-1)[:, None, :]           # (R,1,FW) f32

    rp_idx = relative_position_index(W1, W2)
    bias = jnp.transpose(params["bias_table"][rp_idx], (2, 0, 1))    # (H, N, N)
    bias_t = jnp.concatenate([bias] * L, axis=-1)                    # (H, N, L*N)
    ba_in = ba[:, None, :]                                           # (T, 1, D)

    kernel = _make_fused_kernel(L, XY, N, D, H, Dh, T)

    grid_spec = pltpu.PrefetchScalarGridSpec(
        num_scalar_prefetch=1,
        grid=(B,),
        in_specs=[
            pl.BlockSpec((1, L, M, D), lambda b, t: (b, 0, 0, 0)),     # x slab (bf16)
            pl.BlockSpec((R, D, FW), lambda b, t: (0, 0, 0)),          # fused weights (resident)
            pl.BlockSpec((R, 1, FW), lambda b, t: (0, 0, 0)),          # fused biases
            pl.BlockSpec((H, N, L * N), lambda b, t: (0, 0, 0)),       # tiled rel-pos bias
            pl.BlockSpec((T, 1, D), lambda b, t: (0, 0, 0)),           # ba
        ],
        out_specs=pl.BlockSpec((1, M, D), lambda b, t: (b, 0, 0)),
        scratch_shapes=[
            pltpu.VMEM((M, D), jnp.bfloat16),             # agent-0 queries
            pltpu.VMEM((XY, L * N, D), jnp.bfloat16),     # K' window-major
            pltpu.VMEM((XY, L * N, H * D), jnp.bfloat16), # V'' window-major (Wa folded)
        ],
    )
    out = pl.pallas_call(
        kernel,
        grid_spec=grid_spec,
        out_shape=jax.ShapeDtypeStruct((B, M, D), jnp.float32),
        compiler_params=pltpu.CompilerParams(dimension_semantics=("parallel",)),
    )(types, x_flat, Wfused, bfused, bias_t, ba_in)

    return out.reshape(B, X, Y, W1, W2, D)[:, None]      # (B, 1, X, Y, W1, W2, D)


# --------------------------------------------------------------------------
# pure-JAX reference (mirrors the PyTorch forward, mask=None, exclude_self=False)
# --------------------------------------------------------------------------
def reference_forward(x, types, params):
    B, L, X, Y, W1, W2, D = x.shape
    H, Dh = HEADS, DIM_HEAD
    prec = jax.lax.Precision.HIGHEST

    def proj(W, b):
        return (jnp.einsum("blxyuvd,blde->blxyuve", x, W[types], precision=prec)
                + b[types][:, :, None, None, None, None, :])

    q = proj(params["Wq"], params["bq"])
    k = proj(params["Wk"], params["bk"])
    v = proj(params["Wv"], params["bv"])

    def split_heads(t):
        t = t.reshape(B, L, X, Y, W1, W2, H, Dh)
        return jnp.transpose(t, (0, 2, 3, 6, 1, 4, 5, 7))   # b x y h l w1 w2 d

    q = split_heads(q)[:, :, :, :, :1] * SCALE
    k = split_heads(k)
    v = split_heads(v)

    rel = types[:, 0:1] * NUM_TYPES + types
    w_att = params["rel_att"][rel][:, None]                  # (B, 1, L, H, Dh, Dh)
    w_msg = params["rel_msg"][rel][:, None]

    sim = jnp.einsum("bxyhacdp,bazhpq,bxyhzefq->bxyhacdzef", q, w_att, k,
                     precision=prec)
    rp_idx = relative_position_index(W1, W2)
    bias = jnp.transpose(params["bias_table"][rp_idx], (2, 0, 1)).reshape(
        H, W1, W2, W1, W2)
    sim = sim + bias[None, None, None, :, None, :, :, None, :, :]
    sim_flat = sim.reshape(B, X, Y, H, W1 * W2, L * W1 * W2)
    attn = jax.nn.softmax(sim_flat, axis=-1).reshape(sim.shape)
    v_msg = jnp.einsum("bazhpq,bxyhzefp->bxyhazefq", w_msg, v, precision=prec)
    out = jnp.einsum("bxyhacdzef,bxyhazefq->bxyhacdq", attn, v_msg, precision=prec)
    out = jnp.transpose(out, (0, 4, 1, 2, 5, 6, 3, 7)).reshape(B, 1, X, Y, W1, W2, D)
    wa_g = params["Wa"][types[:, 0]]
    ba_g = params["ba"][types[:, 0]]
    out = (jnp.einsum("baxycdi,bij->baxycdj", out, wa_g, precision=prec)
           + ba_g[:, None, None, None, None, None, :])
    return out


if __name__ == "__main__":
    key = jax.random.PRNGKey(0)
    k_x, k_t, k_p = jax.random.split(key, 3)

    B, L, X, Y = 2, AGENT_SIZE, 2, 2
    x = jax.random.normal(k_x, (B, L, X, Y, WINDOW, WINDOW, DIM), jnp.float32)
    types = jax.random.randint(k_t, (B, L), 0, NUM_TYPES).astype(jnp.int32)
    params = make_params(k_p)

    # TODO(synk): dropout inside a_linears is a no-op at inference and is omitted;
    # mask / exclude_self branches are not exercised (forward uses mask=None).
    out = hetero_attention_forward(x, types, params)
    out = jax.block_until_ready(out)

    ref = reference_forward(x, types, params)
    # bf16 MXU operands with f32 accumulation/softmax vs an f32 HIGHEST reference.
    np.testing.assert_allclose(np.asarray(out), np.asarray(ref), rtol=3e-2, atol=3e-3)
    assert out.shape == (B, 1, X, Y, WINDOW, WINDOW, DIM)
    print("KERNEL_OK")
</pallas_src>

<mosaic_0001>
module attributes {stable_mosaic.version = 11 : i64} {
  func.func @kernel(%arg0: i32, %arg1: memref<2x3xi32, #tpu.memory_space<smem>>, %arg2: memref<1x3x64x32xbf16, #tpu.memory_space<vmem>>, %arg3: memref<4x32x128xbf16, #tpu.memory_space<vmem>>, %arg4: memref<4x1x128xf32, #tpu.memory_space<vmem>>, %arg5: memref<2x16x48xf32, #tpu.memory_space<vmem>>, %arg6: memref<2x1x32xf32, #tpu.memory_space<vmem>>, %arg7: memref<1x64x32xf32, #tpu.memory_space<vmem>>, %arg8: memref<64x32xbf16, #tpu.memory_space<vmem>>, %arg9: memref<4x48x32xbf16, #tpu.memory_space<vmem>>, %arg10: memref<4x48x64xbf16, #tpu.memory_space<vmem>>) attributes {dimension_semantics = [#tpu.dimension_semantics<parallel>], iteration_bounds = array<i64: 2>, scalar_prefetch = 1 : i64, scratch_operands = 3 : i64, tpu.core_type = #tpu.core_type<tc>, window_params = [{transform_indices = @transform_0, window_bounds = array<i64: 1, 3, 64, 32>}, {pipeline_mode = #tpu.pipeline_mode<synchronous>, transform_indices = @transform_1, window_bounds = array<i64: 4, 32, 128>}, {pipeline_mode = #tpu.pipeline_mode<synchronous>, transform_indices = @transform_2, window_bounds = array<i64: 4, 1, 128>}, {pipeline_mode = #tpu.pipeline_mode<synchronous>, transform_indices = @transform_3, window_bounds = array<i64: 2, 16, 48>}, {pipeline_mode = #tpu.pipeline_mode<synchronous>, transform_indices = @transform_4, window_bounds = array<i64: 2, 1, 32>}, {transform_indices = @transform_5, window_bounds = array<i64: 1, 64, 32>}]} {
    %0 = arith.index_cast %arg0 : i32 to index
    %c0 = arith.constant 0 : index
    %1 = memref.load %arg1[%0, %c0] : memref<2x3xi32, #tpu.memory_space<smem>>
    %c2_i32 = arith.constant 2 : i32
    %2 = arith.muli %1, %c2_i32 : i32
    %3 = arith.index_cast %arg0 : i32 to index
    %c0_0 = arith.constant 0 : index
    %4 = memref.load %arg1[%3, %c0_0] : memref<2x3xi32, #tpu.memory_space<smem>>
    %5 = arith.addi %2, %4 : i32
    %c0_1 = arith.constant 0 : index
    %c0_2 = arith.constant 0 : index
    %c0_3 = arith.constant 0 : index
    %c0_4 = arith.constant 0 : index
    %6 = vector.load %arg2[%c0_1, %c0_2, %c0_3, %c0_4] : memref<1x3x64x32xbf16, #tpu.memory_space<vmem>>, vector<1x1x64x32xbf16>
    %7 = vector.shape_cast %6 : vector<1x1x64x32xbf16> to vector<64x32xbf16>
    %8 = arith.index_cast %5 : i32 to index
    %c0_5 = arith.constant 0 : index
    %c0_6 = arith.constant 0 : index
    %9 = vector.load %arg3[%8, %c0_5, %c0_6] : memref<4x32x128xbf16, #tpu.memory_space<vmem>>, vector<1x32x128xbf16>
    %10 = vector.shape_cast %9 : vector<1x32x128xbf16> to vector<32x128xbf16>
    %cst = arith.constant dense<0.000000e+00> : vector<64x128xf32>
    %11 = tpu.matmul %7, %10, %cst {dimension_numbers = #tpu.dot_dimension_numbers<[1], [0], [0], [1], [0, 0, 1, 1], [], []>} : vector<64x32xbf16>, vector<32x128xbf16>, vector<64x128xf32> -> vector<64x128xf32>
    %12 = arith.index_cast %5 : i32 to index
    %c0_7 = arith.constant 0 : index
    %c0_8 = arith.constant 0 : index
    %13 = vector.load %arg4[%12, %c0_7, %c0_8] : memref<4x1x128xf32, #tpu.memory_space<vmem>>, vector<1x1x128xf32>
    %14 = vector.shape_cast %13 : vector<1x1x128xf32> to vector<1x128xf32>
    %15 = vector.broadcast %14 : vector<1x128xf32> to vector<64x128xf32>
    %16 = arith.addf %11, %15 : vector<64x128xf32>
    %17 = arith.truncf %16 : vector<64x128xf32> to vector<64x128xbf16>
    %18 = vector.extract_strided_slice %17 {offsets = [0, 0], sizes = [64, 32], strides = [1, 1]} : vector<64x128xbf16> to vector<64x32xbf16>
    %c0_9 = arith.constant 0 : index
    %c0_10 = arith.constant 0 : index
    %19 = vector.load %arg8[%c0_9, %c0_10] : memref<64x32xbf16, #tpu.memory_space<vmem>>, vector<64x32xbf16>
    tpu.vector_store %arg8[%c0_9, %c0_10], %18 {strides = array<i32>} : memref<64x32xbf16, #tpu.memory_space<vmem>>, vector<64x32xbf16>,
    %20 = vector.extract_strided_slice %17 {offsets = [0, 32], sizes = [64, 32], strides = [1, 1]} : vector<64x128xbf16> to vector<64x32xbf16>
    %21 = vector.extract_strided_slice %17 {offsets = [0, 64], sizes = [64, 64], strides = [1, 1]} : vector<64x128xbf16> to vector<64x64xbf16>
    %22 = vector.extract_strided_slice %20 {offsets = [0, 0], sizes = [16, 32], strides = [1, 1]} : vector<64x32xbf16> to vector<16x32xbf16>
    %c0_11 = arith.constant 0 : index
    %c0_12 = arith.constant 0 : index
    %c0_13 = arith.constant 0 : index
    %23 = vector.load %arg9[%c0_11, %c0_12, %c0_13] : memref<4x48x32xbf16, #tpu.memory_space<vmem>>, vector<1x16x32xbf16>
    %24 = vector.shape_cast %23 : vector<1x16x32xbf16> to vector<16x32xbf16>
    %25 = vector.shape_cast %22 : vector<16x32xbf16> to vector<1x16x32xbf16>
    tpu.vector_store %arg9[%c0_11, %c0_12, %c0_13], %25 {strides = array<i32>} : memref<4x48x32xbf16, #tpu.memory_space<vmem>>, vector<1x16x32xbf16>,
    %26 = vector.extract_strided_slice %21 {offsets = [0, 0], sizes = [16, 64], strides = [1, 1]} : vector<64x64xbf16> to vector<16x64xbf16>
    %c0_14 = arith.constant 0 : index
    %c0_15 = arith.constant 0 : index
    %c0_16 = arith.constant 0 : index
    %27 = vector.load %arg10[%c0_14, %c0_15, %c0_16] : memref<4x48x64xbf16, #tpu.memory_space<vmem>>, vector<1x16x64xbf16>
    %28 = vector.shape_cast %27 : vector<1x16x64xbf16> to vector<16x64xbf16>
    %29 = vector.shape_cast %26 : vector<16x64xbf16> to vector<1x16x64xbf16>
    tpu.vector_store %arg10[%c0_14, %c0_15, %c0_16], %29 {strides = array<i32>} : memref<4x48x64xbf16, #tpu.memory_space<vmem>>, vector<1x16x64xbf16>,
    %30 = vector.extract_strided_slice %20 {offsets = [16, 0], sizes = [16, 32], strides = [1, 1]} : vector<64x32xbf16> to vector<16x32xbf16>
    %c1 = arith.constant 1 : index
    %c0_17 = arith.constant 0 : index
    %c0_18 = arith.constant 0 : index
    %31 = vector.load %arg9[%c1, %c0_17, %c0_18] : memref<4x48x32xbf16, #tpu.memory_space<vmem>>, vector<1x16x32xbf16>
    %32 = vector.shape_cast %31 : vector<1x16x32xbf16> to vector<16x32xbf16>
    %33 = vector.shape_cast %30 : vector<16x32xbf16> to vector<1x16x32xbf16>
    tpu.vector_store %arg9[%c1, %c0_17, %c0_18], %33 {strides = array<i32>} : memref<4x48x32xbf16, #tpu.memory_space<vmem>>, vector<1x16x32xbf16>,
    %34 = vector.extract_strided_slice %21 {offsets = [16, 0], sizes = [16, 64], strides = [1, 1]} : vector<64x64xbf16> to vector<16x64xbf16>
    %c1_19 = arith.constant 1 : index
    %c0_20 = arith.constant 0 : index
    %c0_21 = arith.constant 0 : index
    %35 = vector.load %arg10[%c1_19, %c0_20, %c0_21] : memref<4x48x64xbf16, #tpu.memory_space<vmem>>, vector<1x16x64xbf16>
    %36 = vector.shape_cast %35 : vector<1x16x64xbf16> to vector<16x64xbf16>
    %37 = vector.shape_cast %34 : vector<16x64xbf16> to vector<1x16x64xbf16>
    tpu.vector_store %arg10[%c1_19, %c0_20, %c0_21], %37 {strides = array<i32>} : memref<4x48x64xbf16, #tpu.memory_space<vmem>>, vector<1x16x64xbf16>,
    %38 = vector.extract_strided_slice %20 {offsets = [32, 0], sizes = [16, 32], strides = [1, 1]} : vector<64x32xbf16> to vector<16x32xbf16>
    %c2 = arith.constant 2 : index
    %c0_22 = arith.constant 0 : index
    %c0_23 = arith.constant 0 : index
    %39 = vector.load %arg9[%c2, %c0_22, %c0_23] : memref<4x48x32xbf16, #tpu.memory_space<vmem>>, vector<1x16x32xbf16>
    %40 = vector.shape_cast %39 : vector<1x16x32xbf16> to vector<16x32xbf16>
    %41 = vector.shape_cast %38 : vector<16x32xbf16> to vector<1x16x32xbf16>
    tpu.vector_store %arg9[%c2, %c0_22, %c0_23], %41 {strides = array<i32>} : memref<4x48x32xbf16, #tpu.memory_space<vmem>>, vector<1x16x32xbf16>,
    %42 = vector.extract_strided_slice %21 {offsets = [32, 0], sizes = [16, 64], strides = [1, 1]} : vector<64x64xbf16> to vector<16x64xbf16>
    %c2_24 = arith.constant 2 : index
    %c0_25 = arith.constant 0 : index
    %c0_26 = arith.constant 0 : index
    %43 = vector.load %arg10[%c2_24, %c0_25, %c0_26] : memref<4x48x64xbf16, #tpu.memory_space<vmem>>, vector<1x16x64xbf16>
    %44 = vector.shape_cast %43 : vector<1x16x64xbf16> to vector<16x64xbf16>
    %45 = vector.shape_cast %42 : vector<16x64xbf16> to vector<1x16x64xbf16>
    tpu.vector_store %arg10[%c2_24, %c0_25, %c0_26], %45 {strides = array<i32>} : memref<4x48x64xbf16, #tpu.memory_space<vmem>>, vector<1x16x64xbf16>,
    %46 = vector.extract_strided_slice %20 {offsets = [48, 0], sizes = [16, 32], strides = [1, 1]} : vector<64x32xbf16> to vector<16x32xbf16>
    %c3 = arith.constant 3 : index
    %c0_27 = arith.constant 0 : index
    %c0_28 = arith.constant 0 : index
    %47 = vector.load %arg9[%c3, %c0_27, %c0_28] : memref<4x48x32xbf16, #tpu.memory_space<vmem>>, vector<1x16x32xbf16>
    %48 = vector.shape_cast %47 : vector<1x16x32xbf16> to vector<16x32xbf16>
    %49 = vector.shape_cast %46 : vector<16x32xbf16> to vector<1x16x32xbf16>
    tpu.vector_store %arg9[%c3, %c0_27, %c0_28], %49 {strides = array<i32>} : memref<4x48x32xbf16, #tpu.memory_space<vmem>>, vector<1x16x32xbf16>,
    %50 = vector.extract_strided_slice %21 {offsets = [48, 0], sizes = [16, 64], strides = [1, 1]} : vector<64x64xbf16> to vector<16x64xbf16>
    %c3_29 = arith.constant 3 : index
    %c0_30 = arith.constant 0 : index
    %c0_31 = arith.constant 0 : index
    %51 = vector.load %arg10[%c3_29, %c0_30, %c0_31] : memref<4x48x64xbf16, #tpu.memory_space<vmem>>, vector<1x16x64xbf16>
    %52 = vector.shape_cast %51 : vector<1x16x64xbf16> to vector<16x64xbf16>
    %53 = vector.shape_cast %50 : vector<16x64xbf16> to vector<1x16x64xbf16>
    tpu.vector_store %arg10[%c3_29, %c0_30, %c0_31], %53 {strides = array<i32>} : memref<4x48x64xbf16, #tpu.memory_space<vmem>>, vector<1x16x64xbf16>,
    %c2_i32_32 = arith.constant 2 : i32
    %54 = arith.muli %1, %c2_i32_32 : i32
    %55 = arith.index_cast %arg0 : i32 to index
    %c1_33 = arith.constant 1 : index
    %56 = memref.load %arg1[%55, %c1_33] : memref<2x3xi32, #tpu.memory_space<smem>>
    %57 = arith.addi %54, %56 : i32
    %c0_34 = arith.constant 0 : index
    %c1_35 = arith.constant 1 : index
    %c0_36 = arith.constant 0 : index
    %c0_37 = arith.constant 0 : index
    %58 = vector.load %arg2[%c0_34, %c1_35, %c0_36, %c0_37] : memref<1x3x64x32xbf16, #tpu.memory_space<vmem>>, vector<1x1x64x32xbf16>
    %59 = vector.shape_cast %58 : vector<1x1x64x32xbf16> to vector<64x32xbf16>
    %60 = arith.index_cast %57 : i32 to index
    %c0_38 = arith.constant 0 : index
    %c0_39 = arith.constant 0 : index
    %61 = vector.load %arg3[%60, %c0_38, %c0_39] : memref<4x32x128xbf16, #tpu.memory_space<vmem>>, vector<1x32x128xbf16>
    %62 = vector.shape_cast %61 : vector<1x32x128xbf16> to vector<32x128xbf16>
    %cst_40 = arith.constant dense<0.000000e+00> : vector<64x128xf32>
    %63 = tpu.matmul %59, %62, %cst_40 {dimension_numbers = #tpu.dot_dimension_numbers<[1], [0], [0], [1], [0, 0, 1, 1], [], []>} : vector<64x32xbf16>, vector<32x128xbf16>, vector<64x128xf32> -> vector<64x128xf32>
    %64 = arith.index_cast %57 : i32 to index
    %c0_41 = arith.constant 0 : index
    %c0_42 = arith.constant 0 : index
    %65 = vector.load %arg4[%64, %c0_41, %c0_42] : memref<4x1x128xf32, #tpu.memory_space<vmem>>, vector<1x1x128xf32>
    %66 = vector.shape_cast %65 : vector<1x1x128xf32> to vector<1x128xf32>
    %67 = vector.broadcast %66 : vector<1x128xf32> to vector<64x128xf32>
    %68 = arith.addf %63, %67 : vector<64x128xf32>
    %69 = arith.truncf %68 : vector<64x128xf32> to vector<64x128xbf16>
    %70 = vector.extract_strided_slice %69 {offsets = [0, 32], sizes = [64, 32], strides = [1, 1]} : vector<64x128xbf16> to vector<64x32xbf16>
    %71 = vector.extract_strided_slice %69 {offsets = [0, 64], sizes = [64, 64], strides = [1, 1]} : vector<64x128xbf16> to vector<64x64xbf16>
    %72 = vector.extract_strided_slice %70 {offsets = [0, 0], sizes = [16, 32], strides = [1, 1]} : vector<64x32xbf16> to vector<16x32xbf16>
    %c0_43 = arith.constant 0 : index
    %c16 = arith.constant 16 : index
    %c0_44 = arith.constant 0 : index
    %73 = vector.load %arg9[%c0_43, %c16, %c0_44] : memref<4x48x32xbf16, #tpu.memory_space<vmem>>, vector<1x16x32xbf16>
    %74 = vector.shape_cast %73 : vector<1x16x32xbf16> to vector<16x32xbf16>
    %75 = vector.shape_cast %72 : vector<16x32xbf16> to vector<1x16x32xbf16>
    tpu.vector_store %arg9[%c0_43, %c16, %c0_44], %75 {strides = array<i32>} : memref<4x48x32xbf16, #tpu.memory_space<vmem>>, vector<1x16x32xbf16>,
    %76 = vector.extract_strided_slice %71 {offsets = [0, 0], sizes = [16, 64], strides = [1, 1]} : vector<64x64xbf16> to vector<16x64xbf16>
    %c0_45 = arith.constant 0 : index
    %c16_46 = arith.constant 16 : index
    %c0_47 = arith.constant 0 : index
    %77 = vector.load %arg10[%c0_45, %c16_46, %c0_47] : memref<4x48x64xbf16, #tpu.memory_space<vmem>>, vector<1x16x64xbf16>
    %78 = vector.shape_cast %77 : vector<1x16x64xbf16> to vector<16x64xbf16>
    %79 = vector.shape_cast %76 : vector<16x64xbf16> to vector<1x16x64xbf16>
    tpu.vector_store %arg10[%c0_45, %c16_46, %c0_47], %79 {strides = array<i32>} : memref<4x48x64xbf16, #tpu.memory_space<vmem>>, vector<1x16x64xbf16>,
    %80 = vector.extract_strided_slice %70 {offsets = [16, 0], sizes = [16, 32], strides = [1, 1]} : vector<64x32xbf16> to vector<16x32xbf16>
    %c1_48 = arith.constant 1 : index
    %c16_49 = arith.constant 16 : index
    %c0_50 = arith.constant 0 : index
    %81 = vector.load %arg9[%c1_48, %c16_49, %c0_50] : memref<4x48x32xbf16, #tpu.memory_space<vmem>>, vector<1x16x32xbf16>
    %82 = vector.shape_cast %81 : vector<1x16x32xbf16> to vector<16x32xbf16>
    %83 = vector.shape_cast %80 : vector<16x32xbf16> to vector<1x16x32xbf16>
    tpu.vector_store %arg9[%c1_48, %c16_49, %c0_50], %83 {strides = array<i32>} : memref<4x48x32xbf16, #tpu.memory_space<vmem>>, vector<1x16x32xbf16>,
    %84 = vector.extract_strided_slice %71 {offsets = [16, 0], sizes = [16, 64], strides = [1, 1]} : vector<64x64xbf16> to vector<16x64xbf16>
    %c1_51 = arith.constant 1 : index
    %c16_52 = arith.constant 16 : index
    %c0_53 = arith.constant 0 : index
    %85 = vector.load %arg10[%c1_51, %c16_52, %c0_53] : memref<4x48x64xbf16, #tpu.memory_space<vmem>>, vector<1x16x64xbf16>
    %86 = vector.shape_cast %85 : vector<1x16x64xbf16> to vector<16x64xbf16>
    %87 = vector.shape_cast %84 : vector<16x64xbf16> to vector<1x16x64xbf16>
    tpu.vector_store %arg10[%c1_51, %c16_52, %c0_53], %87 {strides = array<i32>} : memref<4x48x64xbf16, #tpu.memory_space<vmem>>, vector<1x16x64xbf16>,
    %88 = vector.extract_strided_slice %70 {offsets = [32, 0], sizes = [16, 32], strides = [1, 1]} : vector<64x32xbf16> to vector<16x32xbf16>
    %c2_54 = arith.constant 2 : index
    %c16_55 = arith.constant 16 : index
    %c0_56 = arith.constant 0 : index
    %89 = vector.load %arg9[%c2_54, %c16_55, %c0_56] : memref<4x48x32xbf16, #tpu.memory_space<vmem>>, vector<1x16x32xbf16>
    %90 = vector.shape_cast %89 : vector<1x16x32xbf16> to vector<16x32xbf16>
    %91 = vector.shape_cast %88 : vector<16x32xbf16> to vector<1x16x32xbf16>
    tpu.vector_store %arg9[%c2_54, %c16_55, %c0_56], %91 {strides = array<i32>} : memref<4x48x32xbf16, #tpu.memory_space<vmem>>, vector<1x16x32xbf16>,
    %92 = vector.extract_strided_slice %71 {offsets = [32, 0], sizes = [16, 64], strides = [1, 1]} : vector<64x64xbf16> to vector<16x64xbf16>
    %c2_57 = arith.constant 2 : index
    %c16_58 = arith.constant 16 : index
    %c0_59 = arith.constant 0 : index
    %93 = vector.load %arg10[%c2_57, %c16_58, %c0_59] : memref<4x48x64xbf16, #tpu.memory_space<vmem>>, vector<1x16x64xbf16>
    %94 = vector.shape_cast %93 : vector<1x16x64xbf16> to vector<16x64xbf16>
    %95 = vector.shape_cast %92 : vector<16x64xbf16> to vector<1x16x64xbf16>
    tpu.vector_store %arg10[%c2_57, %c16_58, %c0_59], %95 {strides = array<i32>} : memref<4x48x64xbf16, #tpu.memory_space<vmem>>, vector<1x16x64xbf16>,
    %96 = vector.extract_strided_slice %70 {offsets = [48, 0], sizes = [16, 32], strides = [1, 1]} : vector<64x32xbf16> to vector<16x32xbf16>
    %c3_60 = arith.constant 3 : index
    %c16_61 = arith.constant 16 : index
    %c0_62 = arith.constant 0 : index
    %97 = vector.load %arg9[%c3_60, %c16_61, %c0_62] : memref<4x48x32xbf16, #tpu.memory_space<vmem>>, vector<1x16x32xbf16>
    %98 = vector.shape_cast %97 : vector<1x16x32xbf16> to vector<16x32xbf16>
    %99 = vector.shape_cast %96 : vector<16x32xbf16> to vector<1x16x32xbf16>
    tpu.vector_store %arg9[%c3_60, %c16_61, %c0_62], %99 {strides = array<i32>} : memref<4x48x32xbf16, #tpu.memory_space<vmem>>, vector<1x16x32xbf16>,
    %100 = vector.extract_strided_slice %71 {offsets = [48, 0], sizes = [16, 64], strides = [1, 1]} : vector<64x64xbf16> to vector<16x64xbf16>
    %c3_63 = arith.constant 3 : index
    %c16_64 = arith.constant 16 : index
    %c0_65 = arith.constant 0 : index
    %101 = vector.load %arg10[%c3_63, %c16_64, %c0_65] : memref<4x48x64xbf16, #tpu.memory_space<vmem>>, vector<1x16x64xbf16>
    %102 = vector.shape_cast %101 : vector<1x16x64xbf16> to vector<16x64xbf16>
    %103 = vector.shape_cast %100 : vector<16x64xbf16> to vector<1x16x64xbf16>
    tpu.vector_store %arg10[%c3_63, %c16_64, %c0_65], %103 {strides = array<i32>} : memref<4x48x64xbf16, #tpu.memory_space<vmem>>, vector<1x16x64xbf16>,
    %c2_i32_66 = arith.constant 2 : i32
    %104 = arith.muli %1, %c2_i32_66 : i32
    %105 = arith.index_cast %arg0 : i32 to index
    %c2_67 = arith.constant 2 : index
    %106 = memref.load %arg1[%105, %c2_67] : memref<2x3xi32, #tpu.memory_space<smem>>
    %107 = arith.addi %104, %106 : i32
    %c0_68 = arith.constant 0 : index
    %c2_69 = arith.constant 2 : index
    %c0_70 = arith.constant 0 : index
    %c0_71 = arith.constant 0 : index
    %108 = vector.load %arg2[%c0_68, %c2_69, %c0_70, %c0_71] : memref<1x3x64x32xbf16, #tpu.memory_space<vmem>>, vector<1x1x64x32xbf16>
    %109 = vector.shape_cast %108 : vector<1x1x64x32xbf16> to vector<64x32xbf16>
    %110 = arith.index_cast %107 : i32 to index
    %c0_72 = arith.constant 0 : index
    %c0_73 = arith.constant 0 : index
    %111 = vector.load %arg3[%110, %c0_72, %c0_73] : memref<4x32x128xbf16, #tpu.memory_space<vmem>>, vector<1x32x128xbf16>
    %112 = vector.shape_cast %111 : vector<1x32x128xbf16> to vector<32x128xbf16>
    %cst_74 = arith.constant dense<0.000000e+00> : vector<64x128xf32>
    %113 = tpu.matmul %109, %112, %cst_74 {dimension_numbers = #tpu.dot_dimension_numbers<[1], [0], [0], [1], [0, 0, 1, 1], [], []>} : vector<64x32xbf16>, vector<32x128xbf16>, vector<64x128xf32> -> vector<64x128xf32>
    %114 = arith.index_cast %107 : i32 to index
    %c0_75 = arith.constant 0 : index
    %c0_76 = arith.constant 0 : index
    %115 = vector.load %arg4[%114, %c0_75, %c0_76] : memref<4x1x128xf32, #tpu.memory_space<vmem>>, vector<1x1x128xf32>
    %116 = vector.shape_cast %115 : vector<1x1x128xf32> to vector<1x128xf32>
    %117 = vector.broadcast %116 : vector<1x128xf32> to vector<64x128xf32>
    %118 = arith.addf %113, %117 : vector<64x128xf32>
    %119 = arith.truncf %118 : vector<64x128xf32> to vector<64x128xbf16>
    %120 = vector.extract_strided_slice %119 {offsets = [0, 32], sizes = [64, 32], strides = [1, 1]} : vector<64x128xbf16> to vector<64x32xbf16>
    %121 = vector.extract_strided_slice %119 {offsets = [0, 64], sizes = [64, 64], strides = [1, 1]} : vector<64x128xbf16> to vector<64x64xbf16>
    %122 = vector.extract_strided_slice %120 {offsets = [0, 0], sizes = [16, 32], strides = [1, 1]} : vector<64x32xbf16> to vector<16x32xbf16>
    %c0_77 = arith.constant 0 : index
    %c32 = arith.constant 32 : index
    %c0_78 = arith.constant 0 : index
    %123 = vector.load %arg9[%c0_77, %c32, %c0_78] : memref<4x48x32xbf16, #tpu.memory_space<vmem>>, vector<1x16x32xbf16>
    %124 = vector.shape_cast %123 : vector<1x16x32xbf16> to vector<16x32xbf16>
    %125 = vector.shape_cast %122 : vector<16x32xbf16> to vector<1x16x32xbf16>
    tpu.vector_store %arg9[%c0_77, %c32, %c0_78], %125 {strides = array<i32>} : memref<4x48x32xbf16, #tpu.memory_space<vmem>>, vector<1x16x32xbf16>,
    %126 = vector.extract_strided_slice %121 {offsets = [0, 0], sizes = [16, 64], strides = [1, 1]} : vector<64x64xbf16> to vector<16x64xbf16>
    %c0_79 = arith.constant 0 : index
    %c32_80 = arith.constant 32 : index
    %c0_81 = arith.constant 0 : index
    %127 = vector.load %arg10[%c0_79, %c32_80, %c0_81] : memref<4x48x64xbf16, #tpu.memory_space<vmem>>, vector<1x16x64xbf16>
    %128 = vector.shape_cast %127 : vector<1x16x64xbf16> to vector<16x64xbf16>
    %129 = vector.shape_cast %126 : vector<16x64xbf16> to vector<1x16x64xbf16>
    tpu.vector_store %arg10[%c0_79, %c32_80, %c0_81], %129 {strides = array<i32>} : memref<4x48x64xbf16, #tpu.memory_space<vmem>>, vector<1x16x64xbf16>,
    %130 = vector.extract_strided_slice %120 {offsets = [16, 0], sizes = [16, 32], strides = [1, 1]} : vector<64x32xbf16> to vector<16x32xbf16>
    %c1_82 = arith.constant 1 : index
    %c32_83 = arith.constant 32 : index
    %c0_84 = arith.constant 0 : index
    %131 = vector.load %arg9[%c1_82, %c32_83, %c0_84] : memref<4x48x32xbf16, #tpu.memory_space<vmem>>, vector<1x16x32xbf16>
    %132 = vector.shape_cast %131 : vector<1x16x32xbf16> to vector<16x32xbf16>
    %133 = vector.shape_cast %130 : vector<16x32xbf16> to vector<1x16x32xbf16>
    tpu.vector_store %arg9[%c1_82, %c32_83, %c0_84], %133 {strides = array<i32>} : memref<4x48x32xbf16, #tpu.memory_space<vmem>>, vector<1x16x32xbf16>,
    %134 = vector.extract_strided_slice %121 {offsets = [16, 0], sizes = [16, 64], strides = [1, 1]} : vector<64x64xbf16> to vector<16x64xbf16>
    %c1_85 = arith.constant 1 : index
    %c32_86 = arith.constant 32 : index
    %c0_87 = arith.constant 0 : index
    %135 = vector.load %arg10[%c1_85, %c32_86, %c0_87] : memref<4x48x64xbf16, #tpu.memory_space<vmem>>, vector<1x16x64xbf16>
    %136 = vector.shape_cast %135 : vector<1x16x64xbf16> to vector<16x64xbf16>
    %137 = vector.shape_cast %134 : vector<16x64xbf16> to vector<1x16x64xbf16>
    tpu.vector_store %arg10[%c1_85, %c32_86, %c0_87], %137 {strides = array<i32>} : memref<4x48x64xbf16, #tpu.memory_space<vmem>>, vector<1x16x64xbf16>,
    %138 = vector.extract_strided_slice %120 {offsets = [32, 0], sizes = [16, 32], strides = [1, 1]} : vector<64x32xbf16> to vector<16x32xbf16>
    %c2_88 = arith.constant 2 : index
    %c32_89 = arith.constant 32 : index
    %c0_90 = arith.constant 0 : index
    %139 = vector.load %arg9[%c2_88, %c32_89, %c0_90] : memref<4x48x32xbf16, #tpu.memory_space<vmem>>, vector<1x16x32xbf16>
    %140 = vector.shape_cast %139 : vector<1x16x32xbf16> to vector<16x32xbf16>
    %141 = vector.shape_cast %138 : vector<16x32xbf16> to vector<1x16x32xbf16>
    tpu.vector_store %arg9[%c2_88, %c32_89, %c0_90], %141 {strides = array<i32>} : memref<4x48x32xbf16, #tpu.memory_space<vmem>>, vector<1x16x32xbf16>,
    %142 = vector.extract_strided_slice %121 {offsets = [32, 0], sizes = [16, 64], strides = [1, 1]} : vector<64x64xbf16> to vector<16x64xbf16>
    %c2_91 = arith.constant 2 : index
    %c32_92 = arith.constant 32 : index
    %c0_93 = arith.constant 0 : index
    %143 = vector.load %arg10[%c2_91, %c32_92, %c0_93] : memref<4x48x64xbf16, #tpu.memory_space<vmem>>, vector<1x16x64xbf16>
    %144 = vector.shape_cast %143 : vector<1x16x64xbf16> to vector<16x64xbf16>
    %145 = vector.shape_cast %142 : vector<16x64xbf16> to vector<1x16x64xbf16>
    tpu.vector_store %arg10[%c2_91, %c32_92, %c0_93], %145 {strides = array<i32>} : memref<4x48x64xbf16, #tpu.memory_space<vmem>>, vector<1x16x64xbf16>,
    %146 = vector.extract_strided_slice %120 {offsets = [48, 0], sizes = [16, 32], strides = [1, 1]} : vector<64x32xbf16> to vector<16x32xbf16>
    %c3_94 = arith.constant 3 : index
    %c32_95 = arith.constant 32 : index
    %c0_96 = arith.constant 0 : index
    %147 = vector.load %arg9[%c3_94, %c32_95, %c0_96] : memref<4x48x32xbf16, #tpu.memory_space<vmem>>, vector<1x16x32xbf16>
    %148 = vector.shape_cast %147 : vector<1x16x32xbf16> to vector<16x32xbf16>
    %149 = vector.shape_cast %146 : vector<16x32xbf16> to vector<1x16x32xbf16>
    tpu.vector_store %arg9[%c3_94, %c32_95, %c0_96], %149 {strides = array<i32>} : memref<4x48x32xbf16, #tpu.memory_space<vmem>>, vector<1x16x32xbf16>,
    %150 = vector.extract_strided_slice %121 {offsets = [48, 0], sizes = [16, 64], strides = [1, 1]} : vector<64x64xbf16> to vector<16x64xbf16>
    %c3_97 = arith.constant 3 : index
    %c32_98 = arith.constant 32 : index
    %c0_99 = arith.constant 0 : index
    %151 = vector.load %arg10[%c3_97, %c32_98, %c0_99] : memref<4x48x64xbf16, #tpu.memory_space<vmem>>, vector<1x16x64xbf16>
    %152 = vector.shape_cast %151 : vector<1x16x64xbf16> to vector<16x64xbf16>
    %153 = vector.shape_cast %150 : vector<16x64xbf16> to vector<1x16x64xbf16>
    tpu.vector_store %arg10[%c3_97, %c32_98, %c0_99], %153 {strides = array<i32>} : memref<4x48x64xbf16, #tpu.memory_space<vmem>>, vector<1x16x64xbf16>,
    %154 = arith.index_cast %1 : i32 to index
    %c0_100 = arith.constant 0 : index
    %c0_101 = arith.constant 0 : index
    %155 = vector.load %arg6[%154, %c0_100, %c0_101] : memref<2x1x32xf32, #tpu.memory_space<vmem>>, vector<1x1x32xf32>
    %156 = vector.shape_cast %155 : vector<1x1x32xf32> to vector<1x32xf32>
    %c0_102 = arith.constant 0 : index
    %c0_103 = arith.constant 0 : index
    %c0_104 = arith.constant 0 : index
    %157 = vector.load %arg5[%c0_102, %c0_103, %c0_104] : memref<2x16x48xf32, #tpu.memory_space<vmem>>, vector<1x16x48xf32>
    %158 = vector.shape_cast %157 : vector<1x16x48xf32> to vector<16x48xf32>
    %c1_105 = arith.constant 1 : index
    %c0_106 = arith.constant 0 : index
    %c0_107 = arith.constant 0 : index
    %159 = vector.load %arg5[%c1_105, %c0_106, %c0_107] : memref<2x16x48xf32, #tpu.memory_space<vmem>>, vector<1x16x48xf32>
    %160 = vector.shape_cast %159 : vector<1x16x48xf32> to vector<16x48xf32>
    %c0_108 = arith.constant 0 : index
    %c0_109 = arith.constant 0 : index
    %161 = vector.load %arg8[%c0_108, %c0_109] : memref<64x32xbf16, #tpu.memory_space<vmem>>, vector<16x32xbf16>
    %c0_110 = arith.constant 0 : index
    %c0_111 = arith.constant 0 : index
    %c0_112 = arith.constant 0 : index
    %162 = vector.load %arg9[%c0_110, %c0_111, %c0_112] : memref<4x48x32xbf16, #tpu.memory_space<vmem>>, vector<1x48x32xbf16>
    %163 = vector.shape_cast %162 : vector<1x48x32xbf16> to vector<48x32xbf16>
    %c0_113 = arith.constant 0 : index
    %c0_114 = arith.constant 0 : index
    %c0_115 = arith.constant 0 : index
    %164 = vector.load %arg10[%c0_113, %c0_114, %c0_115] : memref<4x48x64xbf16, #tpu.memory_space<vmem>>, vector<1x48x64xbf16>
    %165 = vector.shape_cast %164 : vector<1x48x64xbf16> to vector<48x64xbf16>
    %166 = vector.extract_strided_slice %161 {offsets = [0, 0], sizes = [16, 16], strides = [1, 1]} : vector<16x32xbf16> to vector<16x16xbf16>
    %167 = vector.extract_strided_slice %163 {offsets = [0, 0], sizes = [48, 16], strides = [1, 1]} : vector<48x32xbf16> to vector<48x16xbf16>
    %cst_116 = arith.constant dense<0.000000e+00> : vector<16x48xf32>
    %168 = tpu.matmul %166, %167, %cst_116 {dimension_numbers = #tpu.dot_dimension_numbers<[1], [1], [0], [0], [0, 0, 1, 0], [], []>} : vector<16x16xbf16>, vector<48x16xbf16>, vector<16x48xf32> -> vector<16x48xf32>
    %169 = arith.addf %168, %158 : vector<16x48xf32>
    %cst_117 = arith.constant dense<0xFF800000> : vector<16xf32>
    %170 = vector.multi_reduction <maximumf>, %169, %cst_117 [1] : vector<16x48xf32> to vector<16xf32>
    %171 = vector.shape_cast %170 : vector<16xf32> to vector<16x1xf32>
    %172 = vector.broadcast %171 : vector<16x1xf32> to vector<16x48xf32>
    %173 = arith.subf %169, %172 : vector<16x48xf32>
    %174 = math.exp %173 : vector<16x48xf32>
    %cst_118 = arith.constant dense<0.000000e+00> : vector<16xf32>
    %175 = vector.multi_reduction <add>, %174, %cst_118 [1] : vector<16x48xf32> to vector<16xf32>
    %176 = vector.shape_cast %175 : vector<16xf32> to vector<16x1xf32>
    %177 = tpu.reciprocal %176 : vector<16x1xf32> -> vector<16x1xf32>
    %178 = arith.truncf %174 : vector<16x48xf32> to vector<16x48xbf16>
    %179 = vector.extract_strided_slice %165 {offsets = [0, 0], sizes = [48, 32], strides = [1, 1]} : vector<48x64xbf16> to vector<48x32xbf16>
    %cst_119 = arith.constant dense<0.000000e+00> : vector<16x32xf32>
    %180 = tpu.matmul %178, %179, %cst_119 {dimension_numbers = #tpu.dot_dimension_numbers<[1], [0], [0], [1], [0, 0, 1, 1], [], []>} : vector<16x48xbf16>, vector<48x32xbf16>, vector<16x32xf32> -> vector<16x32xf32>
    %181 = vector.broadcast %177 : vector<16x1xf32> to vector<16x32xf32>
    %182 = arith.mulf %180, %181 : vector<16x32xf32>
    %183 = vector.extract_strided_slice %161 {offsets = [0, 16], sizes = [16, 16], strides = [1, 1]} : vector<16x32xbf16> to vector<16x16xbf16>
    %184 = vector.extract_strided_slice %163 {offsets = [0, 16], sizes = [48, 16], strides = [1, 1]} : vector<48x32xbf16> to vector<48x16xbf16>
    %cst_120 = arith.constant dense<0.000000e+00> : vector<16x48xf32>
    %185 = tpu.matmul %183, %184, %cst_120 {dimension_numbers = #tpu.dot_dimension_numbers<[1], [1], [0], [0], [0, 0, 1, 0], [], []>} : vector<16x16xbf16>, vector<48x16xbf16>, vector<16x48xf32> -> vector<16x48xf32>
    %186 = arith.addf %185, %160 : vector<16x48xf32>
    %cst_121 = arith.constant dense<0xFF800000> : vector<16xf32>
    %187 = vector.multi_reduction <maximumf>, %186, %cst_121 [1] : vector<16x48xf32> to vector<16xf32>
    %188 = vector.shape_cast %187 : vector<16xf32> to vector<16x1xf32>
    %189 = vector.broadcast %188 : vector<16x1xf32> to vector<16x48xf32>
    %190 = arith.subf %186, %189 : vector<16x48xf32>
    %191 = math.exp %190 : vector<16x48xf32>
    %cst_122 = arith.constant dense<0.000000e+00> : vector<16xf32>
    %192 = vector.multi_reduction <add>, %191, %cst_122 [1] : vector<16x48xf32> to vector<16xf32>
    %193 = vector.shape_cast %192 : vector<16xf32> to vector<16x1xf32>
    %194 = tpu.reciprocal %193 : vector<16x1xf32> -> vector<16x1xf32>
    %195 = arith.truncf %191 : vector<16x48xf32> to vector<16x48xbf16>
    %196 = vector.extract_strided_slice %165 {offsets = [0, 32], sizes = [48, 32], strides = [1, 1]} : vector<48x64xbf16> to vector<48x32xbf16>
    %cst_123 = arith.constant dense<0.000000e+00> : vector<16x32xf32>
    %197 = tpu.matmul %195, %196, %cst_123 {dimension_numbers = #tpu.dot_dimension_numbers<[1], [0], [0], [1], [0, 0, 1, 1], [], []>} : vector<16x48xbf16>, vector<48x32xbf16>, vector<16x32xf32> -> vector<16x32xf32>
    %198 = vector.broadcast %194 : vector<16x1xf32> to vector<16x32xf32>
    %199 = arith.mulf %197, %198 : vector<16x32xf32>
    %200 = arith.addf %182, %199 : vector<16x32xf32>
    %201 = vector.broadcast %156 : vector<1x32xf32> to vector<16x32xf32>
    %202 = arith.addf %200, %201 : vector<16x32xf32>
    %c0_124 = arith.constant 0 : index
    %c0_125 = arith.constant 0 : index
    %c0_126 = arith.constant 0 : index
    %203 = vector.load %arg7[%c0_124, %c0_125, %c0_126] : memref<1x64x32xf32, #tpu.memory_space<vmem>>, vector<1x16x32xf32>
    %204 = vector.shape_cast %203 : vector<1x16x32xf32> to vector<16x32xf32>
    %205 = vector.shape_cast %202 : vector<16x32xf32> to vector<1x16x32xf32>
    tpu.vector_store %arg7[%c0_124, %c0_125, %c0_126], %205 {strides = array<i32>} : memref<1x64x32xf32, #tpu.memory_space<vmem>>, vector<1x16x32xf32>,
    %c16_127 = arith.constant 16 : index
    %c0_128 = arith.constant 0 : index
    %206 = vector.load %arg8[%c16_127, %c0_128] : memref<64x32xbf16, #tpu.memory_space<vmem>>, vector<16x32xbf16>
    %c1_129 = arith.constant 1 : index
    %c0_130 = arith.constant 0 : index
    %c0_131 = arith.constant 0 : index
    %207 = vector.load %arg9[%c1_129, %c0_130, %c0_131] : memref<4x48x32xbf16, #tpu.memory_space<vmem>>, vector<1x48x32xbf16>
    %208 = vector.shape_cast %207 : vector<1x48x32xbf16> to vector<48x32xbf16>
    %c1_132 = arith.constant 1 : index
    %c0_133 = arith.constant 0 : index
    %c0_134 = arith.constant 0 : index
    %209 = vector.load %arg10[%c1_132, %c0_133, %c0_134] : memref<4x48x64xbf16, #tpu.memory_space<vmem>>, vector<1x48x64xbf16>
    %210 = vector.shape_cast %209 : vector<1x48x64xbf16> to vector<48x64xbf16>
    %211 = vector.extract_strided_slice %206 {offsets = [0, 0], sizes = [16, 16], strides = [1, 1]} : vector<16x32xbf16> to vector<16x16xbf16>
    %212 = vector.extract_strided_slice %208 {offsets = [0, 0], sizes = [48, 16], strides = [1, 1]} : vector<48x32xbf16> to vector<48x16xbf16>
    %cst_135 = arith.constant dense<0.000000e+00> : vector<16x48xf32>
    %213 = tpu.matmul %211, %212, %cst_135 {dimension_numbers = #tpu.dot_dimension_numbers<[1], [1], [0], [0], [0, 0, 1, 0], [], []>} : vector<16x16xbf16>, vector<48x16xbf16>, vector<16x48xf32> -> vector<16x48xf32>
    %214 = arith.addf %213, %158 : vector<16x48xf32>
    %cst_136 = arith.constant dense<0xFF800000> : vector<16xf32>
    %215 = vector.multi_reduction <maximumf>, %214, %cst_136 [1] : vector<16x48xf32> to vector<16xf32>
    %216 = vector.shape_cast %215 : vector<16xf32> to vector<16x1xf32>
    %217 = vector.broadcast %216 : vector<16x1xf32> to vector<16x48xf32>
    %218 = arith.subf %214, %217 : vector<16x48xf32>
    %219 = math.exp %218 : vector<16x48xf32>
    %cst_137 = arith.constant dense<0.000000e+00> : vector<16xf32>
    %220 = vector.multi_reduction <add>, %219, %cst_137 [1] : vector<16x48xf32> to vector<16xf32>
    %221 = vector.shape_cast %220 : vector<16xf32> to vector<16x1xf32>
    %222 = tpu.reciprocal %221 : vector<16x1xf32> -> vector<16x1xf32>
    %223 = arith.truncf %219 : vector<16x48xf32> to vector<16x48xbf16>
    %224 = vector.extract_strided_slice %210 {offsets = [0, 0], sizes = [48, 32], strides = [1, 1]} : vector<48x64xbf16> to vector<48x32xbf16>
    %cst_138 = arith.constant dense<0.000000e+00> : vector<16x32xf32>
    %225 = tpu.matmul %223, %224, %cst_138 {dimension_numbers = #tpu.dot_dimension_numbers<[1], [0], [0], [1], [0, 0, 1, 1], [], []>} : vector<16x48xbf16>, vector<48x32xbf16>, vector<16x32xf32> -> vector<16x32xf32>
    %226 = vector.broadcast %222 : vector<16x1xf32> to vector<16x32xf32>
    %227 = arith.mulf %225, %226 : vector<16x32xf32>
    %228 = vector.extract_strided_slice %206 {offsets = [0, 16], sizes = [16, 16], strides = [1, 1]} : vector<16x32xbf16> to vector<16x16xbf16>
    %229 = vector.extract_strided_slice %208 {offsets = [0, 16], sizes = [48, 16], strides = [1, 1]} : vector<48x32xbf16> to vector<48x16xbf16>
    %cst_139 = arith.constant dense<0.000000e+00> : vector<16x48xf32>
    %230 = tpu.matmul %228, %229, %cst_139 {dimension_numbers = #tpu.dot_dimension_numbers<[1], [1], [0], [0], [0, 0, 1, 0], [], []>} : vector<16x16xbf16>, vector<48x16xbf16>, vector<16x48xf32> -> vector<16x48xf32>
    %231 = arith.addf %230, %160 : vector<16x48xf32>
    %cst_140 = arith.constant dense<0xFF800000> : vector<16xf32>
    %232 = vector.multi_reduction <maximumf>, %231, %cst_140 [1] : vector<16x48xf32> to vector<16xf32>
    %233 = vector.shape_cast %232 : vector<16xf32> to vector<16x1xf32>
    %234 = vector.broadcast %233 : vector<16x1xf32> to vector<16x48xf32>
    %235 = arith.subf %231, %234 : vector<16x48xf32>
    %236 = math.exp %235 : vector<16x48xf32>
    %cst_141 = arith.constant dense<0.000000e+00> : vector<16xf32>
    %237 = vector.multi_reduction <add>, %236, %cst_141 [1] : vector<16x48xf32> to vector<16xf32>
    %238 = vector.shape_cast %237 : vector<16xf32> to vector<16x1xf32>
    %239 = tpu.reciprocal %238 : vector<16x1xf32> -> vector<16x1xf32>
    %240 = arith.truncf %236 : vector<16x48xf32> to vector<16x48xbf16>
    %241 = vector.extract_strided_slice %210 {offsets = [0, 32], sizes = [48, 32], strides = [1, 1]} : vector<48x64xbf16> to vector<48x32xbf16>
    %cst_142 = arith.constant dense<0.000000e+00> : vector<16x32xf32>
    %242 = tpu.matmul %240, %241, %cst_142 {dimension_numbers = #tpu.dot_dimension_numbers<[1], [0], [0], [1], [0, 0, 1, 1], [], []>} : vector<16x48xbf16>, vector<48x32xbf16>, vector<16x32xf32> -> vector<16x32xf32>
    %243 = vector.broadcast %239 : vector<16x1xf32> to vector<16x32xf32>
    %244 = arith.mulf %242, %243 : vector<16x32xf32>
    %245 = arith.addf %227, %244 : vector<16x32xf32>
    %246 = vector.broadcast %156 : vector<1x32xf32> to vector<16x32xf32>
    %247 = arith.addf %245, %246 : vector<16x32xf32>
    %c0_143 = arith.constant 0 : index
    %c16_144 = arith.constant 16 : index
    %c0_145 = arith.constant 0 : index
    %248 = vector.load %arg7[%c0_143, %c16_144, %c0_145] : memref<1x64x32xf32, #tpu.memory_space<vmem>>, vector<1x16x32xf32>
    %249 = vector.shape_cast %248 : vector<1x16x32xf32> to vector<16x32xf32>
    %250 = vector.shape_cast %247 : vector<16x32xf32> to vector<1x16x32xf32>
    tpu.vector_store %arg7[%c0_143, %c16_144, %c0_145], %250 {strides = array<i32>} : memref<1x64x32xf32, #tpu.memory_space<vmem>>, vector<1x16x32xf32>,
    %c32_146 = arith.constant 32 : index
    %c0_147 = arith.constant 0 : index
    %251 = vector.load %arg8[%c32_146, %c0_147] : memref<64x32xbf16, #tpu.memory_space<vmem>>, vector<16x32xbf16>
    %c2_148 = arith.constant 2 : index
    %c0_149 = arith.constant 0 : index
    %c0_150 = arith.constant 0 : index
    %252 = vector.load %arg9[%c2_148, %c0_149, %c0_150] : memref<4x48x32xbf16, #tpu.memory_space<vmem>>, vector<1x48x32xbf16>
    %253 = vector.shape_cast %252 : vector<1x48x32xbf16> to vector<48x32xbf16>
    %c2_151 = arith.constant 2 : index
    %c0_152 = arith.constant 0 : index
    %c0_153 = arith.constant 0 : index
    %254 = vector.load %arg10[%c2_151, %c0_152, %c0_153] : memref<4x48x64xbf16, #tpu.memory_space<vmem>>, vector<1x48x64xbf16>
    %255 = vector.shape_cast %254 : vector<1x48x64xbf16> to vector<48x64xbf16>
    %256 = vector.extract_strided_slice %251 {offsets = [0, 0], sizes = [16, 16], strides = [1, 1]} : vector<16x32xbf16> to vector<16x16xbf16>
    %257 = vector.extract_strided_slice %253 {offsets = [0, 0], sizes = [48, 16], strides = [1, 1]} : vector<48x32xbf16> to vector<48x16xbf16>
    %cst_154 = arith.constant dense<0.000000e+00> : vector<16x48xf32>
    %258 = tpu.matmul %256, %257, %cst_154 {dimension_numbers = #tpu.dot_dimension_numbers<[1], [1], [0], [0], [0, 0, 1, 0], [], []>} : vector<16x16xbf16>, vector<48x16xbf16>, vector<16x48xf32> -> vector<16x48xf32>
    %259 = arith.addf %258, %158 : vector<16x48xf32>
    %cst_155 = arith.constant dense<0xFF800000> : vector<16xf32>
    %260 = vector.multi_reduction <maximumf>, %259, %cst_155 [1] : vector<16x48xf32> to vector<16xf32>
    %261 = vector.shape_cast %260 : vector<16xf32> to vector<16x1xf32>
    %262 = vector.broadcast %261 : vector<16x1xf32> to vector<16x48xf32>
    %263 = arith.subf %259, %262 : vector<16x48xf32>
    %264 = math.exp %263 : vector<16x48xf32>
    %cst_156 = arith.constant dense<0.000000e+00> : vector<16xf32>
    %265 = vector.multi_reduction <add>, %264, %cst_156 [1] : vector<16x48xf32> to vector<16xf32>
    %266 = vector.shape_cast %265 : vector<16xf32> to vector<16x1xf32>
    %267 = tpu.reciprocal %266 : vector<16x1xf32> -> vector<16x1xf32>
    %268 = arith.truncf %264 : vector<16x48xf32> to vector<16x48xbf16>
    %269 = vector.extract_strided_slice %255 {offsets = [0, 0], sizes = [48, 32], strides = [1, 1]} : vector<48x64xbf16> to vector<48x32xbf16>
    %cst_157 = arith.constant dense<0.000000e+00> : vector<16x32xf32>
    %270 = tpu.matmul %268, %269, %cst_157 {dimension_numbers = #tpu.dot_dimension_numbers<[1], [0], [0], [1], [0, 0, 1, 1], [], []>} : vector<16x48xbf16>, vector<48x32xbf16>, vector<16x32xf32> -> vector<16x32xf32>
    %271 = vector.broadcast %267 : vector<16x1xf32> to vector<16x32xf32>
    %272 = arith.mulf %270, %271 : vector<16x32xf32>
    %273 = vector.extract_strided_slice %251 {offsets = [0, 16], sizes = [16, 16], strides = [1, 1]} : vector<16x32xbf16> to vector<16x16xbf16>
    %274 = vector.extract_strided_slice %253 {offsets = [0, 16], sizes = [48, 16], strides = [1, 1]} : vector<48x32xbf16> to vector<48x16xbf16>
    %cst_158 = arith.constant dense<0.000000e+00> : vector<16x48xf32>
    %275 = tpu.matmul %273, %274, %cst_158 {dimension_numbers = #tpu.dot_dimension_numbers<[1], [1], [0], [0], [0, 0, 1, 0], [], []>} : vector<16x16xbf16>, vector<48x16xbf16>, vector<16x48xf32> -> vector<16x48xf32>
    %276 = arith.addf %275, %160 : vector<16x48xf32>
    %cst_159 = arith.constant dense<0xFF800000> : vector<16xf32>
    %277 = vector.multi_reduction <maximumf>, %276, %cst_159 [1] : vector<16x48xf32> to vector<16xf32>
    %278 = vector.shape_cast %277 : vector<16xf32> to vector<16x1xf32>
    %279 = vector.broadcast %278 : vector<16x1xf32> to vector<16x48xf32>
    %280 = arith.subf %276, %279 : vector<16x48xf32>
    %281 = math.exp %280 : vector<16x48xf32>
    %cst_160 = arith.constant dense<0.000000e+00> : vector<16xf32>
    %282 = vector.multi_reduction <add>, %281, %cst_160 [1] : vector<16x48xf32> to vector<16xf32>
    %283 = vector.shape_cast %282 : vector<16xf32> to vector<16x1xf32>
    %284 = tpu.reciprocal %283 : vector<16x1xf32> -> vector<16x1xf32>
    %285 = arith.truncf %281 : vector<16x48xf32> to vector<16x48xbf16>
    %286 = vector.extract_strided_slice %255 {offsets = [0, 32], sizes = [48, 32], strides = [1, 1]} : vector<48x64xbf16> to vector<48x32xbf16>
    %cst_161 = arith.constant dense<0.000000e+00> : vector<16x32xf32>
    %287 = tpu.matmul %285, %286, %cst_161 {dimension_numbers = #tpu.dot_dimension_numbers<[1], [0], [0], [1], [0, 0, 1, 1], [], []>} : vector<16x48xbf16>, vector<48x32xbf16>, vector<16x32xf32> -> vector<16x32xf32>
    %288 = vector.broadcast %284 : vector<16x1xf32> to vector<16x32xf32>
    %289 = arith.mulf %287, %288 : vector<16x32xf32>
    %290 = arith.addf %272, %289 : vector<16x32xf32>
    %291 = vector.broadcast %156 : vector<1x32xf32> to vector<16x32xf32>
    %292 = arith.addf %290, %291 : vector<16x32xf32>
    %c0_162 = arith.constant 0 : index
    %c32_163 = arith.constant 32 : index
    %c0_164 = arith.constant 0 : index
    %293 = vector.load %arg7[%c0_162, %c32_163, %c0_164] : memref<1x64x32xf32, #tpu.memory_space<vmem>>, vector<1x16x32xf32>
    %294 = vector.shape_cast %293 : vector<1x16x32xf32> to vector<16x32xf32>
    %295 = vector.shape_cast %292 : vector<16x32xf32> to vector<1x16x32xf32>
    tpu.vector_store %arg7[%c0_162, %c32_163, %c0_164], %295 {strides = array<i32>} : memref<1x64x32xf32, #tpu.memory_space<vmem>>, vector<1x16x32xf32>,
    %c48 = arith.constant 48 : index
    %c0_165 = arith.constant 0 : index
    %296 = vector.load %arg8[%c48, %c0_165] : memref<64x32xbf16, #tpu.memory_space<vmem>>, vector<16x32xbf16>
    %c3_166 = arith.constant 3 : index
    %c0_167 = arith.constant 0 : index
    %c0_168 = arith.constant 0 : index
    %297 = vector.load %arg9[%c3_166, %c0_167, %c0_168] : memref<4x48x32xbf16, #tpu.memory_space<vmem>>, vector<1x48x32xbf16>
    %298 = vector.shape_cast %297 : vector<1x48x32xbf16> to vector<48x32xbf16>
    %c3_169 = arith.constant 3 : index
    %c0_170 = arith.constant 0 : index
    %c0_171 = arith.constant 0 : index
    %299 = vector.load %arg10[%c3_169, %c0_170, %c0_171] : memref<4x48x64xbf16, #tpu.memory_space<vmem>>, vector<1x48x64xbf16>
    %300 = vector.shape_cast %299 : vector<1x48x64xbf16> to vector<48x64xbf16>
    %301 = vector.extract_strided_slice %296 {offsets = [0, 0], sizes = [16, 16], strides = [1, 1]} : vector<16x32xbf16> to vector<16x16xbf16>
    %302 = vector.extract_strided_slice %298 {offsets = [0, 0], sizes = [48, 16], strides = [1, 1]} : vector<48x32xbf16> to vector<48x16xbf16>
    %cst_172 = arith.constant dense<0.000000e+00> : vector<16x48xf32>
    %303 = tpu.matmul %301, %302, %cst_172 {dimension_numbers = #tpu.dot_dimension_numbers<[1], [1], [0], [0], [0, 0, 1, 0], [], []>} : vector<16x16xbf16>, vector<48x16xbf16>, vector<16x48xf32> -> vector<16x48xf32>
    %304 = arith.addf %303, %158 : vector<16x48xf32>
    %cst_173 = arith.constant dense<0xFF800000> : vector<16xf32>
    %305 = vector.multi_reduction <maximumf>, %304, %cst_173 [1] : vector<16x48xf32> to vector<16xf32>
    %306 = vector.shape_cast %305 : vector<16xf32> to vector<16x1xf32>
    %307 = vector.broadcast %306 : vector<16x1xf32> to vector<16x48xf32>
    %308 = arith.subf %304, %307 : vector<16x48xf32>
    %309 = math.exp %308 : vector<16x48xf32>
    %cst_174 = arith.constant dense<0.000000e+00> : vector<16xf32>
    %310 = vector.multi_reduction <add>, %309, %cst_174 [1] : vector<16x48xf32> to vector<16xf32>
    %311 = vector.shape_cast %310 : vector<16xf32> to vector<16x1xf32>
    %312 = tpu.reciprocal %311 : vector<16x1xf32> -> vector<16x1xf32>
    %313 = arith.truncf %309 : vector<16x48xf32> to vector<16x48xbf16>
    %314 = vector.extract_strided_slice %300 {offsets = [0, 0], sizes = [48, 32], strides = [1, 1]} : vector<48x64xbf16> to vector<48x32xbf16>
    %cst_175 = arith.constant dense<0.000000e+00> : vector<16x32xf32>
    %315 = tpu.matmul %313, %314, %cst_175 {dimension_numbers = #tpu.dot_dimension_numbers<[1], [0], [0], [1], [0, 0, 1, 1], [], []>} : vector<16x48xbf16>, vector<48x32xbf16>, vector<16x32xf32> -> vector<16x32xf32>
    %316 = vector.broadcast %312 : vector<16x1xf32> to vector<16x32xf32>
    %317 = arith.mulf %315, %316 : vector<16x32xf32>
    %318 = vector.extract_strided_slice %296 {offsets = [0, 16], sizes = [16, 16], strides = [1, 1]} : vector<16x32xbf16> to vector<16x16xbf16>
    %319 = vector.extract_strided_slice %298 {offsets = [0, 16], sizes = [48, 16], strides = [1, 1]} : vector<48x32xbf16> to vector<48x16xbf16>
    %cst_176 = arith.constant dense<0.000000e+00> : vector<16x48xf32>
    %320 = tpu.matmul %318, %319, %cst_176 {dimension_numbers = #tpu.dot_dimension_numbers<[1], [1], [0], [0], [0, 0, 1, 0], [], []>} : vector<16x16xbf16>, vector<48x16xbf16>, vector<16x48xf32> -> vector<16x48xf32>
    %321 = arith.addf %320, %160 : vector<16x48xf32>
    %cst_177 = arith.constant dense<0xFF800000> : vector<16xf32>
    %322 = vector.multi_reduction <maximumf>, %321, %cst_177 [1] : vector<16x48xf32> to vector<16xf32>
    %323 = vector.shape_cast %322 : vector<16xf32> to vector<16x1xf32>
    %324 = vector.broadcast %323 : vector<16x1xf32> to vector<16x48xf32>
    %325 = arith.subf %321, %324 : vector<16x48xf32>
    %326 = math.exp %325 : vector<16x48xf32>
    %cst_178 = arith.constant dense<0.000000e+00> : vector<16xf32>
    %327 = vector.multi_reduction <add>, %326, %cst_178 [1] : vector<16x48xf32> to vector<16xf32>
    %328 = vector.shape_cast %327 : vector<16xf32> to vector<16x1xf32>
    %329 = tpu.reciprocal %328 : vector<16x1xf32> -> vector<16x1xf32>
    %330 = arith.truncf %326 : vector<16x48xf32> to vector<16x48xbf16>
    %331 = vector.extract_strided_slice %300 {offsets = [0, 32], sizes = [48, 32], strides = [1, 1]} : vector<48x64xbf16> to vector<48x32xbf16>
    %cst_179 = arith.constant dense<0.000000e+00> : vector<16x32xf32>
    %332 = tpu.matmul %330, %331, %cst_179 {dimension_numbers = #tpu.dot_dimension_numbers<[1], [0], [0], [1], [0, 0, 1, 1], [], []>} : vector<16x48xbf16>, vector<48x32xbf16>, vector<16x32xf32> -> vector<16x32xf32>
    %333 = vector.broadcast %329 : vector<16x1xf32> to vector<16x32xf32>
    %334 = arith.mulf %332, %333 : vector<16x32xf32>
    %335 = arith.addf %317, %334 : vector<16x32xf32>
    %336 = vector.broadcast %156 : vector<1x32xf32> to vector<16x32xf32>
    %337 = arith.addf %335, %336 : vector<16x32xf32>
    %c0_180 = arith.constant 0 : index
    %c48_181 = arith.constant 48 : index
    %c0_182 = arith.constant 0 : index
    %338 = vector.load %arg7[%c0_180, %c48_181, %c0_182] : memref<1x64x32xf32, #tpu.memory_space<vmem>>, vector<1x16x32xf32>
    %339 = vector.shape_cast %338 : vector<1x16x32xf32> to vector<16x32xf32>
    %340 = vector.shape_cast %337 : vector<16x32xf32> to vector<1x16x32xf32>
    tpu.vector_store %arg7[%c0_180, %c48_181, %c0_182], %340 {strides = array<i32>} : memref<1x64x32xf32, #tpu.memory_space<vmem>>, vector<1x16x32xf32>,
    return
  }
  func.func @transform_0(%arg0: i32, %arg1: memref<2x3xi32, #tpu.memory_space<smem>>) -> (i32, i32, i32, i32) {
    %c0_i32 = arith.constant 0 : i32
    %c0_i32_0 = arith.constant 0 : i32
    %c0_i32_1 = arith.constant 0 : i32
    %c0_i32_2 = arith.constant 0 : i32
    return %arg0, %c0_i32, %c0_i32_0, %c0_i32_1 : i32, i32, i32, i32
  }
  func.func @transform_1(%arg0: i32, %arg1: memref<2x3xi32, #tpu.memory_space<smem>>) -> (i32, i32, i32) {
    %c0_i32 = arith.constant 0 : i32
    %c0_i32_0 = arith.constant 0 : i32
    %c0_i32_1 = arith.constant 0 : i32
    %c0_i32_2 = arith.constant 0 : i32
    return %c0_i32, %c0_i32_0, %c0_i32_1 : i32, i32, i32
  }
  func.func @transform_2(%arg0: i32, %arg1: memref<2x3xi32, #tpu.memory_space<smem>>) -> (i32, i32, i32) {
    %c0_i32 = arith.constant 0 : i32
    %c0_i32_0 = arith.constant 0 : i32
    %c0_i32_1 = arith.constant 0 : i32
    %c0_i32_2 = arith.constant 0 : i32
    return %c0_i32, %c0_i32_0, %c0_i32_1 : i32, i32, i32
  }
  func.func @transform_3(%arg0: i32, %arg1: memref<2x3xi32, #tpu.memory_space<smem>>) -> (i32, i32, i32) {
    %c0_i32 = arith.constant 0 : i32
    %c0_i32_0 = arith.constant 0 : i32
    %c0_i32_1 = arith.constant 0 : i32
    %c0_i32_2 = arith.constant 0 : i32
    return %c0_i32, %c0_i32_0, %c0_i32_1 : i32, i32, i32
  }
  func.func @transform_4(%arg0: i32, %arg1: memref<2x3xi32, #tpu.memory_space<smem>>) -> (i32, i32, i32) {
    %c0_i32 = arith.constant 0 : i32
    %c0_i32_0 = arith.constant 0 : i32
    %c0_i32_1 = arith.constant 0 : i32
    %c0_i32_2 = arith.constant 0 : i32
    return %c0_i32, %c0_i32_0, %c0_i32_1 : i32, i32, i32
  }
  func.func @transform_5(%arg0: i32, %arg1: memref<2x3xi32, #tpu.memory_space<smem>>) -> (i32, i32, i32) {
    %c0_i32 = arith.constant 0 : i32
    %c0_i32_0 = arith.constant 0 : i32
    %c0_i32_1 = arith.constant 0 : i32
    return %arg0, %c0_i32, %c0_i32_0 : i32, i32, i32
  }
}

</mosaic_0001>

<bundles_post_ra>
// kernel: tpu_custom_call.1
= control target key start
LH: loop header
LB: loop body
LE: loop exit
PB: predicated region body
PF: predicated region fallthrough
CT: control target
= control target key end

     0   :  { %s3047_s0 = inlined_call_operand.vmem [shape: s32[2,3], index: 0, kind: input, shape index: {}]   ;;  %s3048_s1 = inlined_call_operand.vmem [shape: bf16[2,3,64,32], index: 1, kind: input, shape index: {}]   ;;  %s3049_s2 = inlined_call_operand.vmem [shape: bf16[4,32,128], index: 2, kind: input, shape index: {}]   ;;  %s3050_s3 = inlined_call_operand.vmem [shape: f32[4,1,128], index: 3, kind: input, shape index: {}]   ;;  %s3051_s4 = inlined_call_operand.vmem [shape: f32[2,16,48], index: 4, kind: input, shape index: {}]   ;;  %s3052_s5 = inlined_call_operand.vmem [shape: f32[2,1,32], index: 5, kind: input, shape index: {}]   ;;  %s3053_s6 = inlined_call_operand.vmem [shape: f32[2,64,32], index: 6, kind: output, shape index: {}]  }
   0x1   :  { %s11_s23 = sshll.u32 %s3047_s0, 4  ;;  %s12_s23 = int_to_ptr.vmem [resolvable:$true] %s11_s23 }
   0x2   :  { %s2438_s24 = scalar_lea.vmem %s12_s23, 32  ;;  %p2443_p1 = scmp.lt.s32.totalorder %s12_s23, %s12_s23 }
   0x3   :  { %p2439_p0 = scmp.ne.s32.totalorder %s12_s23, %s2438_s24  ;;  %p2444_p2 = scmp.lt.s32.totalorder %s2438_s24, %s2438_s24 }
   0x5   :  { %p2445_p3 = por %p2444_p2, %p2443_p1 }
   0x7   :  { %p2446_p4 = pnand %p2445_p3, %p2439_p0 }
   0x9   :  { %2449 = shalt.err (!%p2446_p4)  }
   0xa   :  { %s2460_s25 = smov [#allocation6]  }
   0xb   :  { %14 = dma.vmem_to_smem %s12_s23, 32, %s2460_s25, [#allocation5] }
   0xc   :  { %2454 = dma.done.wait [#allocation5], 32 }
   0xd   :  { %2455 = vsyncadd [#allocation5], 4294967264 }
   0xe   :  { %16 = sfence }
   0xf   :  { %s2504_s26 = smov 0  }
  0x10 LB: > { %s1973_s0 = sadd.s32 4294967295, %s2458_s26   ;;  %p1977_p5 = scmp.ge.s32.totalorder %s2458_s26, 1  ;;  %s2458_s26 = sphi %s2504_s26, %s22_s26  }
  0x11   : > { %p194_p6 = scmp.lt.s32.totalorder %s2458_s26, 3 }
  0x13   : > { %p195_p7 = pnand %p1977_p5, %p194_p6 }
  0x14   : > { %s1981_s27 = sshll.u32 (!%p195_p7), %s1973_s0, 7  ;;  %p222_p8 = scmp.lt.s32.totalorder (!%p195_p7), %s1973_s0, 1  ;;  %vm292_vm0 = vcmask (!%p195_p7), 261120   ;;  %v2461_v17 = vmov (!%p195_p7), 0.0   ;;  %vm2463_vm1 = vmmov (!%p195_p7), 0   ;;  %vm787_vm2 = vcmask (!%p195_p7), 130048  }
  0x15   : > { %198 = sbr.rel (%p195_p7) target bundleno = 3526 (0xdc6), region = 40  ;;  %s2512_s28 = sld [smem:[#allocation6 + %s1981_s27]] (!%p195_p7)  ;;  %vm386_vm3 = vcmask (!%p195_p7), 523264   ;;  %vm841_vm4 = vcmask (!%p195_p7), 392192  }
  0x16   : > { %s421_s29 = sadd.s32 (!%p195_p7), 1, %s1981_s27  ;;  %s597_s7 = sadd.s32 (!%p195_p7), 2, %s1981_s27 }
  0x17   : > { %s422_s30 = sld [smem:[#allocation6 + %s421_s29]] (!%p195_p7)  ;;  %s2464_s18 = smov (!%p195_p7), 112  }
  0x18   : > { %s598_s8 = sld [smem:[#allocation6 + %s597_s7]] (!%p195_p7) }
  0x1b   : > { %s1982_s10 = sshll.u32 (!%p195_p7), %s2512_s28, 1  ;;  %s773_s7 = scalar_lea.vmem (!%p195_p7), %s3052_s5, %s2512_s28 }
  0x1c   : > { %s3055_s0 = smov (!%p222_p8, %s1973_s0), 1  ;;  %s2524_s14 = sadd.s32 %s1982_s10, %s2512_s28 }
  0x1d   : > { %s2341_s9 = smul.u32 96, %s3055_s0  ;;  %s2526_s15 = sadd.s32 %s1982_s10, %s422_s30 }
  0x1e   : > { %s2060_s16 = sshll.u32 %s2524_s14, 4  ;;  %s2061_s20 = sshll.u32 %s2526_s15, 4 }
  0x1f   : > { %s2521_s13 = scalar_lea.vmem %s3048_s1, %s2341_s9  ;;  %s247_s19 = scalar_lea.vmem %s3049_s2, %s2060_s16 }
  0x20   : > { %v2359_v0 = vld [vmem:[%s2521_s13] sm:$0xff]   ;;  %s435_s23 = scalar_lea.vmem %s3049_s2, %s2061_s20  ;;  %v2357_v3 = vld [vmem:[%s247_s19 + $0x8] sm:$0xff]   ;;  %s2539_s24 = sadd.s32 %s1982_s10, %s598_s8  ;;  %v2365_v8 = vld [vmem:[%s2521_s13 + $0x10] sm:$0xff]  }
  0x21   : > { %2149 = vmatprep.mubr.msk.bf16.mxu0 %vm292_vm0, %v2359_v0  ;;  %v2363_v1 = vld [vmem:[%s2521_s13 + $0x20] sm:$0xff]   ;;  %s2062_s25 = sshll.u32 %s2539_s24, 4  ;;  %v2361_v5 = vld [vmem:[%s435_s23 + $0x8] sm:$0xff]   ;;  %v2366_v11 = vld [vmem:[%s2521_s13 + $0x18] sm:$0xff]   ;;  %s252_s9 = scalar_lea.vmem %s3050_s3, %s2524_s14 }
  0x22   : > { %v2356_v2 = vld [vmem:[%s247_s19] sm:$0xff]   ;;  %2161 = vmatprep.mubr.msk.bf16.mxu1 %vm292_vm0, %v2363_v1  ;;  %s611_s30 = scalar_lea.vmem %s3049_s2, %s2062_s25  ;;  %v2360_v7 = vld [vmem:[%s2521_s13 + $0x8] sm:$0xff]   ;;  %s440_s12 = scalar_lea.vmem %s3050_s3, %s2526_s15  ;;  %v2370_v47 = vld [vmem:[%s2521_s13 + $0x30] sm:$0xff]  }
  0x23   : > { %2145 = vmatprep.subr.bf16.mxu0 %v2356_v2  ;;  %v2358_v4 = vld [vmem:[%s435_s23] sm:$0xff]   ;;  %v2364_v9 = vld [vmem:[%s2521_s13 + $0x28] sm:$0xff]   ;;  %s2462_s14 = smov 96   ;;  %s616_s17 = scalar_lea.vmem %s3050_s3, %s2539_s24  ;;  %v2371_v48 = vld [vmem:[%s2521_s13 + $0x38] sm:$0xff]  }
  0x24   : > { %2146 = vmatpush3.bf16.msra.mxu0 %v2356_v2  ;;  %2157 = vmatprep.subr.bf16.mxu1 %v2358_v4  ;;  %v2362_v6 = vld [vmem:[%s611_s30] sm:$0xff]   ;;  %v2367_v10 = vld [vmem:[%s611_s30 + $0x8] sm:$0xff]   ;;  %s2465_s19 = smov 64   ;;  %s2059_s8 = sshll.u32 %s3055_s0, 6 }
  0x25   : > { %2147 = vmatprep.subr.bf16.mxu0 %v2357_v3  ;;  %2158 = vmatpush3.bf16.msra.mxu1 %v2358_v4  ;;  %v2368_v12 = vld [vmem:[%s2521_s13 + $0x40] sm:$0xff]   ;;  %v2369_v13 = vld [vmem:[%s2521_s13 + $0x48] sm:$0xff]   ;;  %s3006_s10 = scalar_lea.vmem %s3053_s6, %s2059_s8 }
  0x26   : > { %2159 = vmatprep.subr.bf16.mxu1 %v2361_v5  ;;  %v1985_v14 = vld [vmem:[%s252_s9] ss:$0 sm:$0xff] }
  0x27   : > { %v2566_v15 = vld [vmem:[%s440_s12] ss:$0 sm:$0xff] }
  0x28   : > { %2148 = vmatpush3.bf16.msra.mxu0 %v2357_v3  ;;  %v2599_v49 = vld [vmem:[%s616_s17] ss:$0 sm:$0xff] }
  0x29   : > { %2169 = vmatprep.subr.bf16.mxu0 %v2362_v6  ;;  %2160 = vmatpush3.bf16.msra.mxu1 %v2361_v5 }
  0x2a   : > { %2181 = vmatprep.subr.bf16.mxu1 %v2461_v17 }
  0x2b   : > { %2150 = vmatmul.mubr.msk.bf16.vlgmr.msra.gmra.mrb[0].mxu0 %vm292_vm0, %v2360_v7 }
  0x2c   : > { %2170 = vmatpush3.bf16.msra.mxu0 %v2362_v6  ;;  %2153 = vmatprep.mubr.msk.bf16.mxu0 %vm292_vm0, %v2365_v8 }
  0x2d   : > { %2162 = vmatmul.mubr.msk.bf16.vlgmr.msra.gmra.mrb[0].mxu1 %vm292_vm0, %v2364_v9  ;;  %2171 = vmatprep.subr.bf16.mxu0 %v2367_v10 }
  0x2e   : > { %2165 = vmatprep.mubr.msk.bf16.mxu1 %vm292_vm0, %v2370_v47 }
  0x30   : > { %2172 = vmatpush3.bf16.msra.mxu0 %v2367_v10 }
  0x31   : > { %2191 = vmatprep.subr.bf16.mxu0 %v2461_v17 }
  0x33   : > { %2154 = vmatmul.mubr.msk.bf16.gmra.mrb[4].mxu0 %vm292_vm0, %v2366_v11 }
  0x34   : > { %2173 = vmatprep.mubr.msk.bf16.mxu0 %vm292_vm0, %v2368_v12 }
  0x35   : > { %2166 = vmatmul.mubr.msk.bf16.gmra.mrb[4].mxu1 %vm292_vm0, %v2371_v48  ;;  %v2694_v48 = vld [vmem:[%s3051_s4 + $0x18] sm:$0xff] }
  0x36   : > { %2187 = vmatprep.mubr.msk.bf16.mxu1 %vm2463_vm1, %v2461_v17 }
  0x3b   : > { %2174 = vmatmul.mubr.msk.bf16.vlgmr.msra.gmra.mrb[8].mxu0 %vm292_vm0, %v2369_v13 }
  0xfe   : > { %v2151_v16 = vpop.f32.mrb[0].mxu0 }
  0xff   : > { %v348_v18 = vadd.f32 %v2151_v16, %v1985_v14  ;;  %v339_v19 = vpop.f32.mrb[1].mxu0 }
 0x100   : > { %v340_v20 = vadd.f32 %v1985_v14, %v339_v19  ;;  %v2152_v21 = vpop.f32.mrb[2].mxu0  ;;  %v2163_v22 = vpop.f32.mrb[0].mxu1 }
 0x101   : > { %v351_v23 = vadd.f32 %v2152_v21, %v1985_v14  ;;  %v342_v24 = vpop.f32.mrb[3].mxu0  ;;  %v535_v25 = vadd.f32 %v2163_v22, %v2566_v15  ;;  %v526_v26 = vpop.f32.mrb[1].mxu1 }
 0x102   : > { %v343_v27 = vadd.f32 %v1985_v14, %v342_v24  ;;  %v527_v28 = vadd.f32 %v2566_v15, %v526_v26  ;;  %v2164_v29 = vpop.f32.mrb[2].mxu1 }
 0x103   : > { %v2572_v30 = vpack.c.bf16 %v351_v23, %v348_v18  ;;  %v538_v31 = vadd.f32 %v2164_v29, %v2566_v15  ;;  %v529_v32 = vpop.f32.mrb[3].mxu1 }
 0x104   : > { %v2575_v33 = vpack.c.bf16 %v343_v27, %v340_v20  ;;  %v530_v34 = vadd.f32 %v2566_v15, %v529_v32 }
 0x105   : > { %375 = vst.msk [vmem:[#allocation2 + $0x8] sm:$0xff] %vm292_vm0, %v2572_v30  ;;  %v2580_v35 = vpack.c.bf16 %v538_v31, %v535_v25  ;;  %v2661_v31 = vld [vmem:[%s3051_s4] sm:$0xff] }
 0x106   : > { %374 = vst.msk [vmem:[#allocation2] sm:$0xff] %vm292_vm0, %v2575_v33  ;;  %v557_v36 = vpack.c.bf16 %v530_v34, %v527_v28  ;;  %v2155_v37 = vpop.f32.mrb[4].mxu0  ;;  %379 = vrot.lane.b32.xlu0 %v2575_v33, %s2462_s14 }
 0x107   : > { %v364_v38 = vadd.f32 %v2155_v37, %v1985_v14  ;;  %v355_v39 = vpop.f32.mrb[5].mxu0 }
 0x108   : > { %v356_v40 = vadd.f32 %v1985_v14, %v355_v39  ;;  %v2156_v41 = vpop.f32.mrb[6].mxu0  ;;  %v2167_v6 = vpop.f32.mrb[4].mxu1 }
 0x109   : > { %v367_v42 = vadd.f32 %v2156_v41, %v1985_v14  ;;  %v358_v43 = vpop.f32.mrb[7].mxu0  ;;  %v551_v7 = vadd.f32 %v2167_v6, %v2566_v15  ;;  %v542_v8 = vpop.f32.mrb[5].mxu1 }
 0x10a   : > { %v359_v44 = vadd.f32 %v1985_v14, %v358_v43  ;;  %562 = vrot.lane.b32.xlu0 %v557_v36, %s2462_s14  ;;  %v543_v9 = vadd.f32 %v2566_v15, %v542_v8  ;;  %v2168_v10 = vpop.f32.mrb[6].mxu1  ;;  %v2373_v43 = vld [vmem:[%s2521_s13 + $0x58] sm:$0xff]  }
 0x10b   : > { %v2591_v45 = vpack.c.bf16 %v367_v42, %v364_v38  ;;  %v554_v11 = vadd.f32 %v2168_v10, %v2566_v15  ;;  %v545_v12 = vpop.f32.mrb[7].mxu1  ;;  %v2372_v42 = vld [vmem:[%s2521_s13 + $0x50] sm:$0xff]  }
 0x10c   : > { %v2593_v46 = vpack.c.bf16 %v359_v44, %v356_v40  ;;  %v546_v13 = vadd.f32 %v2566_v15, %v545_v12  ;;  %2177 = vmatprep.mubr.msk.bf16.mxu0 %vm292_vm0, %v2372_v42  ;;  %v2689_v44 = vld [vmem:[%s3051_s4 + $0x10] sm:$0xff]  ;;  %v1065_v42 = vld [vmem:[#allocation2 + $0x8] sm:$0xff] }
 0x10d   : > { %377 = vst.msk [vmem:[#allocation2 + $0x18] sm:$0xff] %vm292_vm0, %v2591_v45  ;;  %v780_v2 = vld [vmem:[#allocation2] sm:$0xff]  ;;  %v2638_v14 = vpack.c.bf16 %v554_v11, %v551_v7  ;;  %2178 = vmatmul.mubr.msk.bf16.gmra.mrb[12].mxu0 %vm292_vm0, %v2373_v43 }
 0x10e   : > { %376 = vst.msk [vmem:[#allocation2 + $0x10] sm:$0xff] %vm292_vm0, %v2593_v46  ;;  %v2175_v50 = vpop.f32.mrb[8].mxu0  ;;  %v2640_v16 = vpack.c.bf16 %v546_v13, %v543_v9  ;;  %2197 = vmatprep.mubr.msk.bf16.mxu0 %vm2463_vm1, %v2461_v17 }
 0x10f   : > { %v702_v51 = vpop.f32.mrb[9].mxu0  ;;  %v711_v53 = vadd.f32 %v2175_v50, %v2599_v49 }
 0x110   : > { %v2176_v52 = vpop.f32.mrb[10].mxu0  ;;  %v703_v56 = vadd.f32 %v2599_v49, %v702_v51 }
 0x111   : > { %v714_v54 = vadd.f32 %v2176_v52, %v2599_v49  ;;  %v705_v55 = vpop.f32.mrb[11].mxu0 }
 0x112   : > { %v706_v57 = vadd.f32 %v2599_v49, %v705_v55 }
 0x113   : > { %v2609_v58 = vpack.c.bf16 %v714_v54, %v711_v53 }
 0x114   : > { %v733_v59 = vpack.c.bf16 %v706_v57, %v703_v56 }
 0x116   : > { %738 = vrot.lane.b32.xlu1 %v733_v59, %s2462_s14 }
 0x178   : > { %v380_v60 = vpop.permute.xlu0 %379 }
 0x179   : > { %382 = vst.msk [vmem:[#allocation3] sm:$0xff] %vm292_vm0, %v380_v60 }
 0x17c   : > { %v563_v61 = vpop.permute.xlu0 %562 }
 0x17d   : > { %565 = vst.msk [vmem:[#allocation3 + $0x8] sm:$0xff] %vm292_vm0, %v563_v61 }
 0x180   : > { %v781_v62 = vld [vmem:[#allocation3] sm:$0xff] }
 0x181   : > { %915 = vrot.lane.b32.xlu1 %v781_v62, %s2464_s18  ;;  %v792_v63 = vsel %vm787_vm2, %v781_v62, 0 }
 0x182   : > { %2182 = vmatpush3.bf16.xpose.msra.mxu1 %v792_v63 }
 0x183   : > { %2183 = vmatprep.subr.bf16.mxu1 %v2461_v17 }
 0x184   : > { %v782_v0 = vld [vmem:[#allocation3 + $0x8] sm:$0xff] }
 0x185   : > { %917 = vrot.lane.b32.xlu0 %v782_v0, %s2464_s18  ;;  %v795_v3 = vsel %vm787_vm2, %v782_v0, 0 }
 0x188   : > { %v739_v1 = vpop.permute.xlu1 %738 }
 0x189   : > { %741 = vst.msk [vmem:[#allocation3 + $0x10] sm:$0xff] %vm292_vm0, %v739_v1  ;;  %910 = vrot.lane.b32.xlu0 %v780_v2, %s2464_s18 }
 0x18a   : > { %2184 = vmatpush3.bf16.xpose.msra.mxu1 %v795_v3 }
 0x18b   : > { %2185 = vmatprep.subr.bf16.mxu1 %v2461_v17 }
 0x18d   : > { %566 = vrot.lane.b32.xlu0 %v557_v36, %s2465_s19 }
 0x190   : > { %v783_v4 = vld [vmem:[#allocation3 + $0x10] sm:$0xff] }
 0x191   : > { %v798_v5 = vsel %vm787_vm2, %v783_v4, 0  ;;  %919 = vrot.lane.b32.xlu1 %v783_v4, %s2464_s18 }
 0x192   : > { %2186 = vmatpush3.bf16.xpose.msra.mxu1 %v798_v5 }
 0x193   : > { %2201 = vmatprep.subr.bf16.mxu1 %v2461_v17 }
 0x195   : > { %383 = vrot.lane.b32.xlu1 %v2575_v33, %s2465_s19  ;;  %v2666_v33 = vld [vmem:[%s3051_s4 + $0x8] sm:$0xff] }
 0x199   : > { %742 = vrot.lane.b32.xlu1 %v733_v59, %s2465_s19  ;;  %2188 = vmatmul.mubr.msk.bf16.vlgmr.msra.gmra.mrb[8].mxu1 %vm787_vm2, %v780_v2 }
 0x19a   : > { %2207 = vmatprep.mubr.msk.bf16.mxu1 %vm2463_vm1, %v2461_v17 }
 0x1e0   : > { %v2179_v7 = vpop.f32.mrb[12].mxu0 }
 0x1e1   : > { %v727_v8 = vadd.f32 %v2179_v7, %v2599_v49  ;;  %v718_v9 = vpop.f32.mrb[13].mxu0 }
 0x1e2   : > { %v719_v10 = vadd.f32 %v2599_v49, %v718_v9  ;;  %v2180_v11 = vpop.f32.mrb[14].mxu0 }
 0x1e3   : > { %v730_v12 = vadd.f32 %v2180_v11, %v2599_v49  ;;  %v721_v13 = vpop.f32.mrb[15].mxu0 }
 0x1f3   : > { %v916_v18 = vpop.permute.xlu1 %915 }
 0x1f4   : > { %v925_v19 = vsel %vm787_vm2, %v916_v18, 0  ;;  %v722_v18 = vadd.f32 %v2599_v49, %v721_v13 }
 0x1f5   : > { %2202 = vmatpush3.bf16.xpose.msra.mxu1 %v925_v19  ;;  %v2723_v19 = vpack.c.bf16 %v730_v12, %v727_v8 }
 0x1f6   : > { %2203 = vmatprep.subr.bf16.mxu1 %v2461_v17 }
 0x1f7   : > { %v918_v20 = vpop.permute.xlu0 %917 }
 0x1f8   : > { %v928_v22 = vsel %vm787_vm2, %v918_v20, 0  ;;  %v2725_v20 = vpack.c.bf16 %v722_v18, %v719_v10 }
 0x1fb   : > { %v911_v21 = vpop.permute.xlu0 %910 }
 0x1fd   : > { %2204 = vmatpush3.bf16.xpose.msra.mxu1 %v928_v22 }
 0x1fe   : > { %2205 = vmatprep.subr.bf16.mxu1 %v2461_v17 }
 0x1ff   : > { %v567_v23 = vpop.permute.xlu0 %566 }
 0x200   : > { %569 = vst.msk [vmem:[#allocation4 + $0x8] sm:$0xff] %vm386_vm3, %v567_v23 }
 0x203   : > { %v920_v15 = vpop.permute.xlu1 %919 }
 0x204   : > { %v931_v24 = vsel %vm787_vm2, %v920_v15, 0 }
 0x205   : > { %2206 = vmatpush3.bf16.xpose.msra.mxu1 %v931_v24 }
 0x206   : > { %2231 = vmatprep.subr.bf16.mxu1 %v2461_v17 }
 0x207   : > { %v384_v25 = vpop.permute.xlu1 %383  ;;  %v785_v28 = vld [vmem:[#allocation4 + $0x8] sm:$0xff] }
 0x208   : > { %387 = vst.msk [vmem:[#allocation4] sm:$0xff] %vm386_vm3, %v384_v25 }
 0x20b   : > { %v743_v26 = vpop.permute.xlu1 %742 }
 0x20c   : > { %745 = vst.msk [vmem:[#allocation4 + $0x10] sm:$0xff] %vm386_vm3, %v743_v26  ;;  %2208 = vmatmul.mubr.msk.bf16.vlgmr.msra.gmra.mrb[12].mxu1 %vm787_vm2, %v911_v21 }
 0x20d   : > { %2237 = vmatprep.mubr.msk.bf16.mxu1 %vm2463_vm1, %v2461_v17 }
 0x20f   : > { %v784_v27 = vld [vmem:[#allocation4] sm:$0xff] }
 0x210   : > { %998 = vrot.lane.b32.xlu1 %v784_v27, %s2462_s14  ;;  %2192 = vmatpush3.bf16.msra.mxu0 %v784_v27 }
 0x211   : > { %2193 = vmatprep.subr.bf16.mxu0 %v2461_v17 }
 0x213   : > { %v786_v29 = vld [vmem:[#allocation4 + $0x10] sm:$0xff] }
 0x214   : > { %2194 = vmatpush3.bf16.msra.mxu0 %v785_v28 }
 0x215   : > { %2195 = vmatprep.subr.bf16.mxu0 %v2461_v17 }
 0x218   : > { %2196 = vmatpush3.bf16.msra.mxu0 %v786_v29 }
 0x219   : > { %2211 = vmatprep.subr.bf16.mxu0 %v2461_v17 }
 0x26c   : > { %v834_v32 = vpop.f32.mrb[8].mxu1 }
 0x26d   : > { %v835_v34 = vadd.f32 %v834_v32, %v2661_v31  ;;  %v2189_v36 = vpop.f32.mrb[9].mxu1 }
 0x26e   : > { %v837_v37 = vpop.f32.mrb[10].mxu1 }
 0x26f   : > { %v838_v38 = vadd.f32 %v837_v37, %v2666_v33  ;;  %v2190_v39 = vpop.f32.mrb[11].mxu1  ;;  %v842_v40 = vsel %vm841_vm4, %v835_v34, -inf }
 0x270   : > { %843 = vmax.xlane.f32.xlu0 %v842_v40 }
 0x271   : > { %v845_v41 = vsel %vm841_vm4, %v838_v38, -inf }
 0x272   : > { %846 = vmax.xlane.f32.xlu1 %v845_v41 }
 0x282   : > { %v999_v57 = vpop.permute.xlu1 %998 }
 0x283   : > { %389 = vrot.lane.b32.xlu1 %v2572_v30, %s2462_s14 }
 0x286   : > { %1000 = vrot.lane.b32.xlu0 %v785_v28, %s2462_s14 }
 0x287   : > { %1002 = vrot.lane.b32.xlu1 %v786_v29, %s2462_s14 }
 0x28b   : > { %747 = vrot.lane.b32.xlu1 %v2609_v58, %s2462_s14 }
 0x28f   : > { %575 = vrot.lane.b32.xlu1 %v2580_v35, %s2465_s19 }
 0x2df   : > { %v967_v47 = vpop.f32.mrb[12].mxu1 }
 0x2e0   : > { %v968_v50 = vadd.f32 %v2689_v44, %v967_v47  ;;  %v2209_v51 = vpop.f32.mrb[13].mxu1 }
 0x2e1   : > { %v970_v52 = vpop.f32.mrb[14].mxu1 }
 0x2e2   : > { %v971_v53 = vadd.f32 %v2694_v48, %v970_v52  ;;  %v2210_v54 = vpop.f32.mrb[15].mxu1  ;;  %v974_v55 = vsel %vm841_vm4, %v968_v50, -inf }
 0x2e3   : > { %975 = vmax.xlane.f32.xlu0 %v974_v55 }
 0x2e4   : > { %v977_v56 = vsel %vm841_vm4, %v971_v53, -inf }
 0x2e7   : > { %978 = vmax.xlane.f32.xlu0 %v977_v56 }
 0x2fd   : > { %v844_v59 = vpop.xlane.xlu0 %843  ;;  %571 = vrot.lane.b32.xlu0 %v2580_v35, %s2462_s14 }
 0x2fe   : > { %v848_v60 = vsub.f32 %v835_v34, %v844_v59 }
 0x2ff   : > { %v847_v61 = vpop.xlane.xlu1 %846 }
 0x300   : > { %v850_v62 = vmul.f32 1.442695, %v848_v60  ;;  %v849_v63 = vsub.f32 %v838_v38, %v847_v61 }
 0x301   : > { %394 = vrot.lane.b32.xlu0 %v2572_v30, %s2465_s19  ;;  %v1001_v30 = vpop.permute.xlu0 %1000 }
 0x302   : > { %v852_v0 = vmul.f32 1.442695, %v849_v63  ;;  %2374 = vpow2.f32 %v850_v62 }
 0x303   : > { %v390_v1 = vpop.permute.xlu1 %389 }
 0x304   : > { %2376 = vpow2.f32 %v852_v0  ;;  %393 = vst.msk [vmem:[#allocation3 + $0x18] sm:$0xff] %vm292_vm0, %v390_v1 }
 0x307   : > { %v1003_v2 = vpop.permute.xlu1 %1002 }
 0x30b   : > { %v748_v3 = vpop.permute.xlu1 %747  ;;  %v1066_v29 = vld [vmem:[#allocation3 + $0x18] sm:$0xff] }
 0x30c   : > { %750 = vst.msk [vmem:[#allocation3 + $0x28] sm:$0xff] %vm292_vm0, %v748_v3  ;;  %v2706_v4 = vpop.eup %2374  ;;  %v1076_v36 = vsel %vm787_vm2, %v1066_v29, 0 }
 0x30e   : > { %v2708_v35 = vpop.eup %2376 }
 0x30f   : > { %v862_v5 = vpack.c.bf16 %v2708_v35, %v2706_v4  ;;  %v576_v6 = vpop.permute.xlu1 %575 }
 0x310   : > { %578 = vst.msk [vmem:[#allocation4 + $0x20] sm:$0xff] %vm386_vm3, %v576_v6 }
 0x311   : > { %2198 = vmatmul.mubr.msk.bf16.vlgmr.msra.gmra.mrb[16].mxu0 %vm841_vm4, %v862_v5 }
 0x312   : > { %2212 = vmatpush3.bf16.msra.mxu0 %v999_v57  ;;  %2217 = vmatprep.mubr.msk.bf16.mxu0 %vm2463_vm1, %v2461_v17 }
 0x313   : > { %2213 = vmatprep.subr.bf16.mxu0 %v2461_v17  ;;  %v1068_v40 = vld [vmem:[#allocation3 + $0x28] sm:$0xff] }
 0x314   : > { %v1082_v41 = vsel %vm787_vm2, %v1068_v40, 0 }
 0x316   : > { %2214 = vmatpush3.bf16.msra.mxu0 %v1001_v30 }
 0x317   : > { %2215 = vmatprep.subr.bf16.mxu0 %v2461_v17  ;;  %v1070_v37 = vld [vmem:[#allocation4 + $0x20] sm:$0xff] }
 0x31a   : > { %2216 = vmatpush3.bf16.msra.mxu0 %v1003_v2 }
 0x31b   : > { %2221 = vmatprep.subr.bf16.mxu0 %v2461_v17 }
 0x370   : > { %v976_v21 = vpop.xlane.xlu0 %975 }
 0x371   : > { %v980_v22 = vsub.f32 %v968_v50, %v976_v21 }
 0x373   : > { %v982_v23 = vmul.f32 1.442695, %v980_v22 }
 0x374   : > { %v979_v15 = vpop.xlane.xlu0 %978 }
 0x375   : > { %v981_v24 = vsub.f32 %v971_v53, %v979_v15  ;;  %2378 = vpow2.f32 %v982_v23 }
 0x377   : > { %v984_v25 = vmul.f32 1.442695, %v981_v24 }
 0x378   : > { %v572_v26 = vpop.permute.xlu0 %571 }
 0x379   : > { %2380 = vpow2.f32 %v984_v25  ;;  %574 = vst.msk [vmem:[#allocation3 + $0x20] sm:$0xff] %vm292_vm0, %v572_v26 }
 0x37c   : > { %v395_v27 = vpop.permute.xlu0 %394 }
 0x37d   : > { %398 = vst.msk [vmem:[#allocation4 + $0x18] sm:$0xff] %vm386_vm3, %v395_v27 }
 0x37f   : > { %v2729_v28 = vpop.eup %2378 }
 0x380   : > { %v1067_v38 = vld [vmem:[#allocation3 + $0x20] sm:$0xff] }
 0x381   : > { %v1079_v39 = vsel %vm787_vm2, %v1067_v38, 0 }
 0x383   : > { %v2731_v49 = vpop.eup %2380 }
 0x384   : > { %v1069_v32 = vld [vmem:[#allocation4 + $0x18] sm:$0xff]  ;;  %v994_v34 = vpack.c.bf16 %v2731_v49, %v2729_v28 }
 0x385   : > { %2232 = vmatpush3.bf16.msra.mxu1 %v1069_v32 }
 0x386   : > { %2218 = vmatmul.mubr.msk.bf16.vlgmr.msra.gmra.mrb[20].mxu0 %vm841_vm4, %v994_v34  ;;  %2233 = vmatprep.subr.bf16.mxu1 %v2461_v17 }
 0x387   : > { %2222 = vmatpush3.bf16.xpose.msra.mxu0 %v1076_v36  ;;  %2227 = vmatprep.mubr.msk.bf16.mxu0 %vm2463_vm1, %v2461_v17 }
 0x388   : > { %2223 = vmatprep.subr.bf16.mxu0 %v2461_v17 }
 0x389   : > { %2234 = vmatpush3.bf16.msra.mxu1 %v1070_v37 }
 0x38a   : > { %2235 = vmatprep.subr.bf16.mxu1 %v2461_v17 }
 0x38f   : > { %2224 = vmatpush3.bf16.xpose.msra.mxu0 %v1079_v39 }
 0x390   : > { %2225 = vmatprep.subr.bf16.mxu0 %v2461_v17 }
 0x397   : > { %2226 = vmatpush3.bf16.xpose.msra.mxu0 %v1082_v41 }
 0x398   : > { %2251 = vmatprep.subr.bf16.mxu0 %v2461_v17 }
 0x39e   : > { %2228 = vmatmul.mubr.msk.bf16.vlgmr.msra.gmra.mrb[24].mxu0 %vm787_vm2, %v1065_v42 }
 0x39f   : > { %2257 = vmatprep.mubr.msk.bf16.mxu0 %vm2463_vm1, %v2461_v17 }
 0x3e4   : > { %v2749_v43 = vpop.f32.mrb[16].mxu0 }
 0x3e5   : > { %v2199_v47 = vpop.f32.mrb[17].mxu0 }
 0x3e6   : > { %v2751_v50 = vpop.f32.mrb[18].mxu0 }
 0x3e7   : > { %v2200_v51 = vpop.f32.mrb[19].mxu0 }
 0x459   : > { %v2753_v52 = vpop.f32.mrb[20].mxu0 }
 0x45a   : > { %v2219_v53 = vpop.f32.mrb[21].mxu0 }
 0x45b   : > { %v2755_v54 = vpop.f32.mrb[22].mxu0 }
 0x45c   : > { %v2220_v55 = vpop.f32.mrb[23].mxu0 }
 0x471   : > { %v1118_v56 = vpop.f32.mrb[24].mxu0 }
 0x472   : > { %v1119_v57 = vadd.f32 %v1118_v56, %v2661_v31  ;;  %v2229_v59 = vpop.f32.mrb[25].mxu0 }
 0x473   : > { %v1121_v60 = vpop.f32.mrb[26].mxu0 }
 0x474   : > { %v1122_v61 = vadd.f32 %v1121_v60, %v2666_v33  ;;  %v2230_v62 = vpop.f32.mrb[27].mxu0  ;;  %v1125_v63 = vsel %vm841_vm4, %v1119_v57, -inf }
 0x475   : > { %1126 = vmax.xlane.f32.xlu0 %v1125_v63 }
 0x476   : > { %v1128_v0 = vsel %vm841_vm4, %v1122_v61, -inf }
 0x477   : > { %1129 = vmax.xlane.f32.xlu1 %v1128_v0 }
 0x488   : > { %1198 = vrot.lane.b32.xlu1 %v1066_v29, %s2464_s18 }
 0x48b   : > { %751 = vrot.lane.b32.xlu0 %v2609_v58, %s2465_s19 }
 0x48c   : > { %1202 = vrot.lane.b32.xlu1 %v1068_v40, %s2464_s18 }
 0x48f   : > { %1200 = vrot.lane.b32.xlu0 %v1067_v38, %s2464_s18 }
 0x490   : > { %1283 = vrot.lane.b32.xlu1 %v1070_v37, %s2462_s14 }
 0x493   : > { %1193 = vrot.lane.b32.xlu0 %v1065_v42, %s2464_s18 }
 0x494   : > { %400 = vrot.lane.b32.xlu1 %v2593_v46, %s2462_s14 }
 0x497   : > { %1281 = vrot.lane.b32.xlu0 %v1069_v32, %s2462_s14 }
 0x502   : > { %v1127_v1 = vpop.xlane.xlu0 %1126 }
 0x503   : > { %v1131_v2 = vsub.f32 %v1119_v57, %v1127_v1 }
 0x504   : > { %v1130_v3 = vpop.xlane.xlu1 %1129 }
 0x505   : > { %v1133_v5 = vmul.f32 1.442695, %v1131_v2  ;;  %v1132_v6 = vsub.f32 %v1122_v61, %v1130_v3 }
 0x506   : > { %v752_v30 = vpop.permute.xlu0 %751 }
 0x507   : > { %v1135_v58 = vmul.f32 1.442695, %v1132_v6  ;;  %754 = vst.msk [vmem:[#allocation4 + $0x28] sm:$0xff] %vm386_vm3, %v752_v30  ;;  %2382 = vpow2.f32 %v1133_v5 }
 0x508   : > { %v1199_v7 = vpop.permute.xlu1 %1198 }
 0x509   : > { %2384 = vpow2.f32 %v1135_v58  ;;  %v1208_v15 = vsel %vm787_vm2, %v1199_v7, 0 }
 0x50a   : > { %v1201_v8 = vpop.permute.xlu0 %1200 }
 0x50b   : > { %v1211_v24 = vsel %vm787_vm2, %v1201_v8, 0  ;;  %v1342_v8 = vld [vmem:[#allocation2 + $0x10] sm:$0xff] }
 0x50c   : > { %v1203_v9 = vpop.permute.xlu1 %1202 }
 0x50d   : > { %v1214_v25 = vsel %vm787_vm2, %v1203_v9, 0 }
 0x50e   : > { %v1194_v10 = vpop.permute.xlu0 %1193  ;;  %v1071_v11 = vld [vmem:[#allocation4 + $0x28] sm:$0xff] }
 0x50f   : > { %2236 = vmatpush3.bf16.msra.mxu1 %v1071_v11 }
 0x510   : > { %v1284_v12 = vpop.permute.xlu1 %1283  ;;  %2241 = vmatprep.subr.bf16.mxu1 %v2461_v17 }
 0x511   : > { %v2773_v13 = vpop.eup %2382 }
 0x512   : > { %v1282_v18 = vpop.permute.xlu0 %1281 }
 0x513   : > { %v2775_v21 = vpop.eup %2384  ;;  %2252 = vmatpush3.bf16.msra.mxu0 %v1282_v18 }
 0x514   : > { %v401_v22 = vpop.permute.xlu1 %400  ;;  %v1145_v23 = vpack.c.bf16 %v2775_v21, %v2773_v13  ;;  %2253 = vmatprep.subr.bf16.mxu0 %v2461_v17 }
 0x515   : > { %404 = vst.msk [vmem:[#allocation3 + $0x30] sm:$0xff] %vm292_vm0, %v401_v22 }
 0x516   : > { %2238 = vmatmul.mubr.msk.bf16.vlgmr.msra.gmra.mrb[16].mxu1 %vm841_vm4, %v1145_v23 }
 0x517   : > { %2254 = vmatpush3.bf16.msra.mxu0 %v1284_v12  ;;  %2247 = vmatprep.mubr.msk.bf16.mxu1 %vm2463_vm1, %v2461_v17 }
 0x518   : > { %2242 = vmatpush3.bf16.xpose.msra.mxu1 %v1208_v15  ;;  %2255 = vmatprep.subr.bf16.mxu0 %v2461_v17 }
 0x519   : > { %2243 = vmatprep.subr.bf16.mxu1 %v2461_v17 }
 0x51c   : > { %v1343_v0 = vld [vmem:[#allocation3 + $0x30] sm:$0xff] }
 0x51d   : > { %v1353_v2 = vsel %vm787_vm2, %v1343_v0, 0 }
 0x520   : > { %2244 = vmatpush3.bf16.xpose.msra.mxu1 %v1211_v24 }
 0x521   : > { %2245 = vmatprep.subr.bf16.mxu1 %v2461_v17 }
 0x528   : > { %2246 = vmatpush3.bf16.xpose.msra.mxu1 %v1214_v25 }
 0x529   : > { %2271 = vmatprep.subr.bf16.mxu1 %v2461_v17 }
 0x52f   : > { %2248 = vmatmul.mubr.msk.bf16.vlgmr.msra.gmra.mrb[20].mxu1 %vm787_vm2, %v1194_v10 }
 0x530   : > { %2277 = vmatprep.mubr.msk.bf16.mxu1 %vm2463_vm1, %v2461_v17 }
 0x5e9   : > { %v2794_v26 = vpop.f32.mrb[16].mxu1 }
 0x5ea   : > { %v2239_v27 = vpop.f32.mrb[17].mxu1 }
 0x5eb   : > { %v2796_v29 = vpop.f32.mrb[18].mxu1 }
 0x5ec   : > { %v2240_v32 = vpop.f32.mrb[19].mxu1 }
 0x602   : > { %v1250_v34 = vpop.f32.mrb[20].mxu1 }
 0x603   : > { %v1251_v36 = vadd.f32 %v2689_v44, %v1250_v34  ;;  %v2249_v37 = vpop.f32.mrb[21].mxu1 }
 0x604   : > { %v1253_v38 = vpop.f32.mrb[22].mxu1 }
 0x605   : > { %v1254_v39 = vadd.f32 %v2694_v48, %v1253_v38  ;;  %v2250_v40 = vpop.f32.mrb[23].mxu1  ;;  %v1257_v41 = vsel %vm841_vm4, %v1251_v36, -inf }
 0x606   : > { %1258 = vmax.xlane.f32.xlu1 %v1257_v41 }
 0x607   : > { %v1260_v42 = vsel %vm841_vm4, %v1254_v39, -inf }
 0x608   : > { %1261 = vmax.xlane.f32.xlu0 %v1260_v42 }
 0x617   : > { %580 = vrot.lane.b32.xlu1 %v2640_v16, %s2462_s14 }
 0x61b   : > { %584 = vrot.lane.b32.xlu1 %v2640_v16, %s2465_s19 }
 0x61e   : > { %1285 = vrot.lane.b32.xlu0 %v1071_v11, %s2462_s14 }
 0x622   : > { %756 = vrot.lane.b32.xlu0 %v2725_v20, %s2462_s14 }
 0x626   : > { %405 = vrot.lane.b32.xlu0 %v2593_v46, %s2465_s19 }
 0x693   : > { %v1259_v47 = vpop.xlane.xlu1 %1258 }
 0x694   : > { %v1263_v51 = vsub.f32 %v1251_v36, %v1259_v47 }
 0x695   : > { %v1262_v53 = vpop.xlane.xlu0 %1261 }
 0x696   : > { %v1265_v55 = vmul.f32 1.442695, %v1263_v51  ;;  %v1264_v56 = vsub.f32 %v1254_v39, %v1262_v53 }
 0x697   : > { %v581_v57 = vpop.permute.xlu1 %580 }
 0x698   : > { %v1267_v59 = vmul.f32 1.442695, %v1264_v56  ;;  %583 = vst.msk [vmem:[#allocation3 + $0x38] sm:$0xff] %vm292_vm0, %v581_v57  ;;  %2386 = vpow2.f32 %v1265_v55 }
 0x699   : > { %v1286_v60 = vpop.permute.xlu0 %1285 }
 0x69a   : > { %2388 = vpow2.f32 %v1267_v59  ;;  %2256 = vmatpush3.bf16.msra.mxu0 %v1286_v60 }
 0x69b   : > { %v585_v16 = vpop.permute.xlu1 %584  ;;  %2261 = vmatprep.subr.bf16.mxu0 %v2461_v17 }
 0x69c   : > { %587 = vst.msk [vmem:[#allocation4 + $0x38] sm:$0xff] %vm386_vm3, %v585_v16 }
 0x69d   : > { %v757_v61 = vpop.permute.xlu0 %756 }
 0x69e   : > { %759 = vst.msk [vmem:[#allocation3 + $0x40] sm:$0xff] %vm292_vm0, %v757_v61 }
 0x69f   : > { %v1344_v5 = vld [vmem:[#allocation3 + $0x38] sm:$0xff] }
 0x6a0   : > { %v1356_v30 = vsel %vm787_vm2, %v1344_v5, 0 }
 0x6a1   : > { %v406_v46 = vpop.permute.xlu0 %405 }
 0x6a2   : > { %409 = vst.msk [vmem:[#allocation4 + $0x30] sm:$0xff] %vm386_vm3, %v406_v46  ;;  %v2816_v62 = vpop.eup %2386 }
 0x6a3   : > { %v1347_v6 = vld [vmem:[#allocation4 + $0x38] sm:$0xff] }
 0x6a4   : > { %v2818_v63 = vpop.eup %2388 }
 0x6a5   : > { %v1277_v1 = vpack.c.bf16 %v2818_v63, %v2816_v62  ;;  %v1345_v58 = vld [vmem:[#allocation3 + $0x40] sm:$0xff] }
 0x6a6   : > { %v1359_v7 = vsel %vm787_vm2, %v1345_v58, 0 }
 0x6a7   : > { %2258 = vmatmul.mubr.msk.bf16.vlgmr.msra.gmra.mrb[28].mxu0 %vm841_vm4, %v1277_v1 }
 0x6a8   : > { %2262 = vmatpush3.bf16.xpose.msra.mxu0 %v1353_v2  ;;  %2267 = vmatprep.mubr.msk.bf16.mxu0 %vm2463_vm1, %v2461_v17 }
 0x6a9   : > { %v1346_v3 = vld [vmem:[#allocation4 + $0x30] sm:$0xff]  ;;  %2263 = vmatprep.subr.bf16.mxu0 %v2461_v17 }
 0x6aa   : > { %2272 = vmatpush3.bf16.msra.mxu1 %v1346_v3 }
 0x6ab   : > { %2273 = vmatprep.subr.bf16.mxu1 %v2461_v17 }
 0x6ae   : > { %2274 = vmatpush3.bf16.msra.mxu1 %v1347_v6 }
 0x6af   : > { %2275 = vmatprep.subr.bf16.mxu1 %v2461_v17 }
 0x6b0   : > { %2264 = vmatpush3.bf16.xpose.msra.mxu0 %v1356_v30 }
 0x6b1   : > { %2265 = vmatprep.subr.bf16.mxu0 %v2461_v17 }
 0x6b8   : > { %2266 = vmatpush3.bf16.xpose.msra.mxu0 %v1359_v7 }
 0x6b9   : > { %2291 = vmatprep.subr.bf16.mxu0 %v2461_v17 }
 0x6bf   : > { %2268 = vmatmul.mubr.msk.bf16.vlgmr.msra.gmra.mrb[32].mxu0 %vm787_vm2, %v1342_v8 }
 0x6c0   : > { %2297 = vmatprep.mubr.msk.bf16.mxu0 %vm2463_vm1, %v2461_v17 }
 0x77a   : > { %v2836_v9 = vpop.f32.mrb[28].mxu0 }
 0x77b   : > { %v2259_v10 = vpop.f32.mrb[29].mxu0 }
 0x77c   : > { %v2838_v11 = vpop.f32.mrb[30].mxu0 }
 0x77d   : > { %v2260_v12 = vpop.f32.mrb[31].mxu0 }
 0x792   : > { %v1395_v18 = vpop.f32.mrb[32].mxu0 }
 0x793   : > { %v1396_v22 = vadd.f32 %v1395_v18, %v2661_v31  ;;  %v2269_v23 = vpop.f32.mrb[33].mxu0 }
 0x794   : > { %v1398_v15 = vpop.f32.mrb[34].mxu0 }
 0x795   : > { %v1399_v24 = vadd.f32 %v1398_v15, %v2666_v33  ;;  %v2270_v25 = vpop.f32.mrb[35].mxu0  ;;  %v1402_v27 = vsel %vm841_vm4, %v1396_v22, -inf }
 0x796   : > { %1403 = vmax.xlane.f32.xlu1 %v1402_v27 }
 0x797   : > { %v1405_v32 = vsel %vm841_vm4, %v1399_v24, -inf }
 0x798   : > { %1406 = vmax.xlane.f32.xlu0 %v1405_v32 }
 0x7a7   : > { %760 = vrot.lane.b32.xlu1 %v2725_v20, %s2465_s19 }
 0x7ab   : > { %1477 = vrot.lane.b32.xlu1 %v1344_v5, %s2464_s18 }
 0x7ae   : > { %1475 = vrot.lane.b32.xlu0 %v1343_v0, %s2464_s18 }
 0x7af   : > { %1470 = vrot.lane.b32.xlu1 %v1342_v8, %s2464_s18 }
 0x7b2   : > { %1479 = vrot.lane.b32.xlu0 %v1345_v58, %s2464_s18 }
 0x7b3   : > { %1560 = vrot.lane.b32.xlu1 %v1347_v6, %s2462_s14 }
 0x7b6   : > { %1558 = vrot.lane.b32.xlu0 %v1346_v3, %s2462_s14 }
 0x7ba   : > { %411 = vrot.lane.b32.xlu0 %v2591_v45, %s2462_s14 }
 0x823   : > { %v1404_v34 = vpop.xlane.xlu1 %1403 }
 0x824   : > { %v1408_v36 = vsub.f32 %v1396_v22, %v1404_v34 }
 0x825   : > { %v1407_v37 = vpop.xlane.xlu0 %1406 }
 0x826   : > { %v1410_v38 = vmul.f32 1.442695, %v1408_v36  ;;  %v1409_v20 = vsub.f32 %v1399_v24, %v1407_v37 }
 0x827   : > { %v761_v39 = vpop.permute.xlu1 %760 }
 0x828   : > { %v1412_v40 = vmul.f32 1.442695, %v1409_v20  ;;  %763 = vst.msk [vmem:[#allocation4 + $0x40] sm:$0xff] %vm386_vm3, %v761_v39  ;;  %2390 = vpow2.f32 %v1410_v38 }
 0x829   : > { %v1476_v41 = vpop.permute.xlu0 %1475 }
 0x82a   : > { %2392 = vpow2.f32 %v1412_v40  ;;  %v1485_v61 = vsel %vm787_vm2, %v1476_v41, 0 }
 0x82b   : > { %v1478_v42 = vpop.permute.xlu1 %1477 }
 0x82c   : > { %v1488_v46 = vsel %vm787_vm2, %v1478_v42, 0 }
 0x82d   : > { %v1480_v47 = vpop.permute.xlu0 %1479 }
 0x82e   : > { %v1491_v0 = vsel %vm787_vm2, %v1480_v47, 0 }
 0x82f   : > { %v1471_v51 = vpop.permute.xlu1 %1470  ;;  %v1348_v53 = vld [vmem:[#allocation4 + $0x40] sm:$0xff] }
 0x830   : > { %2276 = vmatpush3.bf16.msra.mxu1 %v1348_v53 }
 0x831   : > { %v1559_v55 = vpop.permute.xlu0 %1558  ;;  %2281 = vmatprep.subr.bf16.mxu1 %v2461_v17 }
 0x832   : > { %2292 = vmatpush3.bf16.msra.mxu0 %v1559_v55  ;;  %v2856_v56 = vpop.eup %2390 }
 0x833   : > { %2293 = vmatprep.subr.bf16.mxu0 %v2461_v17  ;;  %v1561_v59 = vpop.permute.xlu1 %1560 }
 0x834   : > { %v2859_v57 = vpop.eup %2392 }
 0x835   : > { %v412_v60 = vpop.permute.xlu0 %411  ;;  %v1422_v16 = vpack.c.bf16 %v2859_v57, %v2856_v56 }
 0x836   : > { %415 = vst.msk [vmem:[#allocation3 + $0x48] sm:$0xff] %vm292_vm0, %v412_v60  ;;  %2294 = vmatpush3.bf16.msra.mxu0 %v1561_v59  ;;  %v1619_v59 = vld [vmem:[#allocation2 + $0x18] sm:$0xff] }
 0x837   : > { %2278 = vmatmul.mubr.msk.bf16.vlgmr.msra.gmra.mrb[24].mxu1 %vm841_vm4, %v1422_v16  ;;  %2295 = vmatprep.subr.bf16.mxu0 %v2461_v17 }
 0x838   : > { %2287 = vmatprep.mubr.msk.bf16.mxu1 %vm2463_vm1, %v2461_v17 }
 0x839   : > { %2282 = vmatpush3.bf16.xpose.msra.mxu1 %v1485_v61 }
 0x83a   : > { %2283 = vmatprep.subr.bf16.mxu1 %v2461_v17 }
 0x83d   : > { %v1620_v39 = vld [vmem:[#allocation3 + $0x48] sm:$0xff] }
 0x83e   : > { %v1630_v41 = vsel %vm787_vm2, %v1620_v39, 0 }
 0x841   : > { %2284 = vmatpush3.bf16.xpose.msra.mxu1 %v1488_v46 }
 0x842   : > { %2285 = vmatprep.subr.bf16.mxu1 %v2461_v17 }
 0x849   : > { %2286 = vmatpush3.bf16.xpose.msra.mxu1 %v1491_v0 }
 0x84a   : > { %2311 = vmatprep.subr.bf16.mxu1 %v2461_v17 }
 0x850   : > { %2288 = vmatmul.mubr.msk.bf16.vlgmr.msra.gmra.mrb[28].mxu1 %vm787_vm2, %v1471_v51 }
 0x851   : > { %2317 = vmatprep.mubr.msk.bf16.mxu1 %vm2463_vm1, %v2461_v17 }
 0x90a   : > { %v2877_v1 = vpop.f32.mrb[24].mxu1 }
 0x90b   : > { %v2279_v2 = vpop.f32.mrb[25].mxu1 }
 0x90c   : > { %v2879_v3 = vpop.f32.mrb[26].mxu1 }
 0x90d   : > { %v2280_v5 = vpop.f32.mrb[27].mxu1 }
 0x923   : > { %v1527_v6 = vpop.f32.mrb[28].mxu1 }
 0x924   : > { %v1528_v30 = vadd.f32 %v2689_v44, %v1527_v6  ;;  %v2289_v58 = vpop.f32.mrb[29].mxu1 }
 0x925   : > { %v1530_v7 = vpop.f32.mrb[30].mxu1 }
 0x926   : > { %v1531_v8 = vadd.f32 %v2694_v48, %v1530_v7  ;;  %v2290_v10 = vpop.f32.mrb[31].mxu1  ;;  %v1534_v12 = vsel %vm841_vm4, %v1528_v30, -inf }
 0x927   : > { %1535 = vmax.xlane.f32.xlu0 %v1534_v12 }
 0x928   : > { %v1537_v18 = vsel %vm841_vm4, %v1531_v8, -inf }
 0x929   : > { %1538 = vmax.xlane.f32.xlu1 %v1537_v18 }
 0x93a   : > { %1562 = vrot.lane.b32.xlu1 %v1348_v53, %s2462_s14 }
 0x93d   : > { %589 = vrot.lane.b32.xlu0 %v2638_v14, %s2462_s14 }
 0x93e   : > { %765 = vrot.lane.b32.xlu1 %v2723_v19, %s2462_s14 }
 0x941   : > { %416 = vrot.lane.b32.xlu0 %v2591_v45, %s2465_s19 }
 0x942   : > { %593 = vrot.lane.b32.xlu1 %v2638_v14, %s2465_s19 }
 0x9b4   : > { %v1536_v22 = vpop.xlane.xlu0 %1535 }
 0x9b5   : > { %v1540_v23 = vsub.f32 %v1528_v30, %v1536_v22 }
 0x9b6   : > { %v1539_v15 = vpop.xlane.xlu1 %1538 }
 0x9b7   : > { %v1542_v24 = vmul.f32 1.442695, %v1540_v23  ;;  %v1541_v25 = vsub.f32 %v1531_v8, %v1539_v15 }
 0x9b8   : > { %v590_v27 = vpop.permute.xlu0 %589 }
 0x9b9   : > { %v1544_v32 = vmul.f32 1.442695, %v1541_v25  ;;  %592 = vst.msk [vmem:[#allocation3 + $0x50] sm:$0xff] %vm292_vm0, %v590_v27  ;;  %2394 = vpow2.f32 %v1542_v24 }
 0x9ba   : > { %v1563_v34 = vpop.permute.xlu1 %1562 }
 0x9bb   : > { %2396 = vpow2.f32 %v1544_v32  ;;  %2296 = vmatpush3.bf16.msra.mxu0 %v1563_v34 }
 0x9bc   : > { %v417_v36 = vpop.permute.xlu0 %416  ;;  %2301 = vmatprep.subr.bf16.mxu0 %v2461_v17 }
 0x9bd   : > { %420 = vst.msk [vmem:[#allocation4 + $0x48] sm:$0xff] %vm386_vm3, %v417_v36 }
 0x9be   : > { %v766_v45 = vpop.permute.xlu1 %765 }
 0x9bf   : > { %768 = vst.msk [vmem:[#allocation3 + $0x58] sm:$0xff] %vm292_vm0, %v766_v45 }
 0x9c0   : > { %v1621_v47 = vld [vmem:[#allocation3 + $0x50] sm:$0xff] }
 0x9c1   : > { %v1633_v51 = vsel %vm787_vm2, %v1621_v47, 0 }
 0x9c2   : > { %v594_v14 = vpop.permute.xlu1 %593 }
 0x9c3   : > { %596 = vst.msk [vmem:[#allocation4 + $0x50] sm:$0xff] %vm386_vm3, %v594_v14  ;;  %v2899_v37 = vpop.eup %2394 }
 0x9c4   : > { %v2901_v38 = vld [vmem:[#allocation4 + $0x48] sm:$0xff] }
 0x9c5   : > { %v2903_v20 = vpop.eup %2396  ;;  %2312 = vmatpush3.bf16.msra.mxu1 %v2901_v38 }
 0x9c6   : > { %v1554_v40 = vpack.c.bf16 %v2903_v20, %v2899_v37  ;;  %2313 = vmatprep.subr.bf16.mxu1 %v2461_v17  ;;  %v1622_v53 = vld [vmem:[#allocation3 + $0x58] sm:$0xff] }
 0x9c7   : > { %v1636_v55 = vsel %vm787_vm2, %v1622_v53, 0 }
 0x9c8   : > { %2298 = vmatmul.mubr.msk.bf16.vlgmr.msra.gmra.mrb[36].mxu0 %vm841_vm4, %v1554_v40 }
 0x9c9   : > { %2302 = vmatpush3.bf16.xpose.msra.mxu0 %v1630_v41  ;;  %2307 = vmatprep.mubr.msk.bf16.mxu0 %vm2463_vm1, %v2461_v17 }
 0x9ca   : > { %v2913_v42 = vld [vmem:[#allocation4 + $0x50] sm:$0xff]  ;;  %2303 = vmatprep.subr.bf16.mxu0 %v2461_v17 }
 0x9cb   : > { %2314 = vmatpush3.bf16.msra.mxu1 %v2913_v42 }
 0x9cc   : > { %2315 = vmatprep.subr.bf16.mxu1 %v2461_v17 }
 0x9d1   : > { %2304 = vmatpush3.bf16.xpose.msra.mxu0 %v1633_v51 }
 0x9d2   : > { %2305 = vmatprep.subr.bf16.mxu0 %v2461_v17 }
 0x9d9   : > { %2306 = vmatpush3.bf16.xpose.msra.mxu0 %v1636_v55 }
 0x9da   : > { %2331 = vmatprep.subr.bf16.mxu0 %v2461_v17 }
 0x9e0   : > { %2308 = vmatmul.mubr.msk.bf16.vlgmr.msra.gmra.mrb[40].mxu0 %vm787_vm2, %v1619_v59 }
 0x9e1   : > { %2337 = vmatprep.mubr.msk.bf16.mxu0 %vm2463_vm1, %v2461_v17 }
 0xa9b   : > { %v2925_v60 = vpop.f32.mrb[36].mxu0 }
 0xa9c   : > { %v2299_v16 = vpop.f32.mrb[37].mxu0 }
 0xa9d   : > { %v2927_v61 = vpop.f32.mrb[38].mxu0 }
 0xa9e   : > { %v2300_v46 = vpop.f32.mrb[39].mxu0 }
 0xab3   : > { %v1672_v0 = vpop.f32.mrb[40].mxu0 }
 0xab4   : > { %v1673_v2 = vadd.f32 %v1672_v0, %v2661_v31  ;;  %v2309_v5 = vpop.f32.mrb[41].mxu0 }
 0xab5   : > { %v1675_v6 = vpop.f32.mrb[42].mxu0 }
 0xab6   : > { %v1676_v30 = vadd.f32 %v1675_v6, %v2666_v33  ;;  %v2310_v58 = vpop.f32.mrb[43].mxu0  ;;  %v1679_v7 = vsel %vm841_vm4, %v1673_v2, -inf  ;;  %v986_v6 = vsel %vm841_vm4, %v2729_v28, 0.0  ;;  %v1414_v28 = vsel %vm841_vm4, %v2856_v56, 0.0 }
 0xab7   : > { %1680 = vmax.xlane.f32.xlu0 %v1679_v7 }
 0xab8   : > { %v1682_v8 = vsel %vm841_vm4, %v1676_v30, -inf }
 0xab9   : > { %1683 = vmax.xlane.f32.xlu1 %v1682_v8 }
 0xaca   : > { %1752 = vrot.lane.b32.xlu1 %v1620_v39, %s2464_s18 }
 0xacd   : > { %769 = vrot.lane.b32.xlu0 %v2723_v19, %s2465_s19 }
 0xace   : > { %1756 = vrot.lane.b32.xlu1 %v1622_v53, %s2464_s18 }
 0xad1   : > { %1754 = vrot.lane.b32.xlu0 %v1621_v47, %s2464_s18 }
 0xad5   : > { %1747 = vrot.lane.b32.xlu0 %v1619_v59, %s2464_s18 }
 0xb44   : > { %v1681_v31 = vpop.xlane.xlu0 %1680 }
 0xb45   : > { %v1685_v33 = vsub.f32 %v1673_v2, %v1681_v31 }
 0xb46   : > { %v1684_v10 = vpop.xlane.xlu1 %1683 }
 0xb47   : > { %v1687_v12 = vmul.f32 1.442695, %v1685_v33  ;;  %v1686_v18 = vsub.f32 %v1676_v30, %v1684_v10  ;;  %v989_v30 = vsel %vm841_vm4, %v2731_v49, 0.0  ;;  %v1546_v49 = vsel %vm841_vm4, %v2899_v37, 0.0 }
 0xb48   : > { %v770_v22 = vpop.permute.xlu0 %769 }
 0xb49   : > { %v1689_v23 = vmul.f32 1.442695, %v1686_v18  ;;  %772 = vst.msk [vmem:[#allocation4 + $0x58] sm:$0xff] %vm386_vm3, %v770_v22  ;;  %2398 = vpow2.f32 %v1687_v12 }
 0xb4a   : > { %v1753_v25 = vpop.permute.xlu1 %1752 }
 0xb4b   : > { %2400 = vpow2.f32 %v1689_v23  ;;  %v1762_v32 = vsel %vm787_vm2, %v1753_v25, 0 }
 0xb4c   : > { %v1755_v34 = vpop.permute.xlu0 %1754 }
 0xb4d   : > { %v1765_v36 = vsel %vm787_vm2, %v1755_v34, 0 }
 0xb4e   : > { %v1757_v45 = vpop.permute.xlu1 %1756 }
 0xb4f   : > { %v1768_v14 = vsel %vm787_vm2, %v1757_v45, 0 }
 0xb50   : > { %v1625_v15 = vld [vmem:[#allocation4 + $0x58] sm:$0xff]  ;;  %v1748_v39 = vpop.permute.xlu0 %1747 }
 0xb51   : > { %2316 = vmatpush3.bf16.msra.mxu1 %v1625_v15 }
 0xb52   : > { %2321 = vmatprep.subr.bf16.mxu1 %v2461_v17 }
 0xb53   : > { %v2399_v19 = vpop.eup %2398 }
 0xb55   : > { %v2401_v24 = vpop.eup %2400 }
 0xb56   : > { %v1699_v27 = vpack.c.bf16 %v2401_v24, %v2399_v19  ;;  %v1694_v56 = vsel %vm841_vm4, %v2401_v24, 0.0 }
 0xb58   : > { %2318 = vmatmul.mubr.msk.bf16.vlgmr.msra.gmra.mrb[32].mxu1 %vm841_vm4, %v1699_v27 }
 0xb59   : > { %2327 = vmatprep.mubr.msk.bf16.mxu1 %vm2463_vm1, %v2461_v17 }
 0xb5a   : > { %2322 = vmatpush3.bf16.xpose.msra.mxu1 %v1762_v32 }
 0xb5b   : > { %2323 = vmatprep.subr.bf16.mxu1 %v2461_v17 }
 0xb62   : > { %2324 = vmatpush3.bf16.xpose.msra.mxu1 %v1765_v36 }
 0xb63   : > { %2325 = vmatprep.subr.bf16.mxu1 %v2461_v17 }
 0xb6a   : > { %2326 = vmatpush3.bf16.xpose.msra.mxu1 %v1768_v14 }
 0xb71   : > { %2328 = vmatmul.mubr.msk.bf16.vlgmr.msra.gmra.mrb[36].mxu1 %vm787_vm2, %v1748_v39 }
 0xc2b   : > { %v2950_v40 = vpop.f32.mrb[32].mxu1 }
 0xc2c   : > { %v2319_v41 = vpop.f32.mrb[33].mxu1 }
 0xc2d   : > { %v2952_v47 = vpop.f32.mrb[34].mxu1 }
 0xc2e   : > { %v2320_v51 = vpop.f32.mrb[35].mxu1 }
 0xc44   : > { %v1804_v53 = vpop.f32.mrb[36].mxu1 }
 0xc45   : > { %v1805_v55 = vadd.f32 %v2689_v44, %v1804_v53  ;;  %v2329_v59 = vpop.f32.mrb[37].mxu1  ;;  %v854_v44 = vsel %vm841_vm4, %v2706_v4, 0.0  ;;  %v1269_v4 = vsel %vm841_vm4, %v2816_v62, 0.0  ;;  %v1417_v62 = vsel %vm841_vm4, %v2859_v57, 0.0  ;;  %v3001_v53 = vld [vmem:[%s773_s7] ss:$0 sm:$0xff] }
 0xc46   : > { %v1807_v16 = vpop.f32.mrb[38].mxu1 }
 0xc47   : > { %v1808_v46 = vadd.f32 %v2694_v48, %v1807_v16  ;;  %v2330_v0 = vpop.f32.mrb[39].mxu1  ;;  %v1811_v2 = vsel %vm841_vm4, %v1805_v55, -inf  ;;  %v857_v48 = vsel %vm841_vm4, %v2708_v35, 0.0  ;;  %v1140_v35 = vsel %vm841_vm4, %v2775_v21, 0.0 }
 0xc48   : > { %1812 = vmax.xlane.f32.xlu1 %v1811_v2  ;;  %v1549_v21 = vsel %vm841_vm4, %v2903_v20, 0.0 }
 0xc49   : > { %v1814_v5 = vsel %vm841_vm4, %v1808_v46, -inf }
 0xc4a   : > { %1815 = vmax.xlane.f32.xlu0 %v1814_v5 }
 0xc59   : > { %1837 = vrot.lane.b32.xlu1 %v2913_v42, %s2462_s14  ;;  %v1137_v42 = vsel %vm841_vm4, %v2773_v13, 0.0  ;;  %v1272_v13 = vsel %vm841_vm4, %v2818_v63, 0.0 }
 0xc5d   : > { %1839 = vrot.lane.b32.xlu1 %v1625_v15, %s2462_s14 }
 0xc60   : > { %1835 = vrot.lane.b32.xlu0 %v2901_v38, %s2462_s14  ;;  %v1691_v38 = vsel %vm841_vm4, %v2399_v19, 0.0 }
 0xc7f   : > { %855 = vadd.xlane.f32.xlu0 %v854_v44 }
 0xc81   : > { %858 = vadd.xlane.f32.xlu1 %v857_v48 }
 0xc83   : > { %987 = vadd.xlane.f32.xlu0 %v986_v6 }
 0xc85   : > { %1138 = vadd.xlane.f32.xlu1 %v1137_v42 }
 0xc87   : > { %990 = vadd.xlane.f32.xlu0 %v989_v30 }
 0xc89   : > { %1270 = vadd.xlane.f32.xlu1 %v1269_v4 }
 0xc8b   : > { %1141 = vadd.xlane.f32.xlu0 %v1140_v35 }
 0xc8d   : > { %1415 = vadd.xlane.f32.xlu1 %v1414_v28 }
 0xc8f   : > { %1273 = vadd.xlane.f32.xlu0 %v1272_v13 }
 0xc91   : > { %1547 = vadd.xlane.f32.xlu1 %v1546_v49 }
 0xc93   : > { %1418 = vadd.xlane.f32.xlu0 %v1417_v62 }
 0xc95   : > { %1692 = vadd.xlane.f32.xlu1 %v1691_v38 }
 0xc97   : > { %1550 = vadd.xlane.f32.xlu0 %v1549_v21 }
 0xc9b   : > { %1695 = vadd.xlane.f32.xlu0 %v1694_v56 }
 0xcd5   : > { %v1813_v63 = vpop.xlane.xlu1 %1812 }
 0xcd6   : > { %v1817_v58 = vsub.f32 %v1805_v55, %v1813_v63 }
 0xcd7   : > { %v1816_v7 = vpop.xlane.xlu0 %1815 }
 0xcd8   : > { %v1819_v8 = vmul.f32 1.442695, %v1817_v58  ;;  %v1818_v37 = vsub.f32 %v1808_v46, %v1816_v7 }
 0xcd9   : > { %v1838_v57 = vpop.permute.xlu1 %1837 }
 0xcda   : > { %2402 = vpow2.f32 %v1819_v8  ;;  %v1821_v31 = vmul.f32 1.442695, %v1818_v37 }
 0xcdb   : > { %v1836_v33 = vpop.permute.xlu0 %1835 }
 0xcdc   : > { %2404 = vpow2.f32 %v1821_v31  ;;  %2332 = vmatpush3.bf16.msra.mxu0 %v1836_v33 }
 0xcdd   : > { %2333 = vmatprep.subr.bf16.mxu0 %v2461_v17  ;;  %v1840_v20 = vpop.permute.xlu1 %1839 }
 0xce0   : > { %2334 = vmatpush3.bf16.msra.mxu0 %v1838_v57 }
 0xce1   : > { %2335 = vmatprep.subr.bf16.mxu0 %v2461_v17 }
 0xce4   : > { %v2403_v10 = vpop.eup %2402  ;;  %2336 = vmatpush3.bf16.msra.mxu0 %v1840_v20 }
 0xce5   : > { %v1823_v12 = vsel %vm841_vm4, %v2403_v10, 0.0 }
 0xce6   : > { %v2405_v18 = vpop.eup %2404  ;;  %1824 = vadd.xlane.f32.xlu1 %v1823_v12 }
 0xce7   : > { %v1826_v22 = vsel %vm841_vm4, %v2405_v18, 0.0  ;;  %v1831_v23 = vpack.c.bf16 %v2405_v18, %v2403_v10 }
 0xce8   : > { %1827 = vadd.xlane.f32.xlu0 %v1826_v22 }
 0xce9   : > { %2338 = vmatmul.mubr.msk.bf16.vlgmr.msra.gmra.mrb[44].mxu0 %vm841_vm4, %v1831_v23 }
 0xd0c   : > { %v856_v15 = vpop.xlane.xlu0 %855 }
 0xd0d   : > { %2406 = vrcp.f32 %v856_v15 }
 0xd0e   : > { %v859_v19 = vpop.xlane.xlu1 %858 }
 0xd10   : > { %v988_v24 = vpop.xlane.xlu0 %987 }
 0xd11   : > { %2408 = vrcp.f32 %v988_v24 }
 0xd12   : > { %v1139_v17 = vpop.xlane.xlu1 %1138  ;;  %2410 = vrcp.f32 %v859_v19 }
 0xd13   : > { %2412 = vrcp.f32 %v1139_v17 }
 0xd14   : > { %v991_v25 = vpop.xlane.xlu0 %990 }
 0xd15   : > { %2414 = vrcp.f32 %v991_v25 }
 0xd16   : > { %v1271_v27 = vpop.xlane.xlu1 %1270 }
 0xd17   : > { %2416 = vrcp.f32 %v1271_v27  ;;  %v2407_v34 = vpop.eup %2406 }
 0xd18   : > { %v1142_v32 = vpop.xlane.xlu0 %1141  ;;  %v907_v14 = vmul.f32 %v2407_v34, %v2749_v43 }
 0xd19   : > { %2418 = vrcp.f32 %v1142_v32 }
 0xd1a   : > { %v1416_v36 = vpop.xlane.xlu1 %1415 }
 0xd1b   : > { %v2409_v45 = vpop.eup %2408  ;;  %2420 = vrcp.f32 %v1416_v36 }
 0xd1c   : > { %v1051_v39 = vmul.f32 %v2409_v45, %v2753_v52  ;;  %v1274_v41 = vpop.xlane.xlu0 %1273  ;;  %v2411_v51 = vpop.eup %2410 }
 0xd1d   : > { %2422 = vrcp.f32 %v1274_v41  ;;  %v2413_v55 = vpop.eup %2412  ;;  %v908_v43 = vmul.f32 %v2411_v51, %v2751_v50 }
 0xd1e   : > { %v1053_v59 = vadd.f32 %v1051_v39, %v907_v14  ;;  %v1548_v16 = vpop.xlane.xlu1 %1547  ;;  %v1190_v44 = vmul.f32 %v2413_v55, %v2794_v26 }
 0xd1f   : > { %v2415_v46 = vpop.eup %2414  ;;  %2424 = vrcp.f32 %v1548_v16 }
 0xd20   : > { %v1061_v52 = vadd.f32 %v3001_v53, %v1053_v59  ;;  %v1052_v0 = vmul.f32 %v2415_v46, %v2755_v54  ;;  %v1419_v2 = vpop.xlane.xlu0 %1418 }
 0xd21   : > { %v2417_v5 = vpop.eup %2416  ;;  %2426 = vrcp.f32 %v1419_v2 }
 0xd22   : > { %1063 = vst.msk [vmem:[%s3006_s10] sm:$0xff] %vm292_vm0, %v1061_v52  ;;  %v1054_v48 = vadd.f32 %v1052_v0, %v908_v43  ;;  %v1334_v6 = vmul.f32 %v2417_v5, %v2836_v9 }
 0xd23   : > { %v2419_v4 = vpop.eup %2418 }
 0xd24   : > { %v1062_v42 = vadd.f32 %v3001_v53, %v1054_v48  ;;  %v1336_v30 = vadd.f32 %v1334_v6, %v1190_v44  ;;  %v1551_v50 = vpop.xlane.xlu0 %1550  ;;  %v1191_v26 = vmul.f32 %v2419_v4, %v2796_v29 }
 0xd25   : > { %2428 = vrcp.f32 %v1551_v50  ;;  %v2421_v35 = vpop.eup %2420 }
 0xd26   : > { %1064 = vst.msk [vmem:[%s3006_s10 + $0x8] sm:$0xff] %vm292_vm0, %v1062_v42  ;;  %v1338_v54 = vadd.f32 %v3001_v53, %v1336_v30  ;;  %v1467_v49 = vmul.f32 %v2421_v35, %v2877_v1 }
 0xd27   : > { %v2423_v28 = vpop.eup %2422 }
 0xd28   : > { %1340 = vst.msk [vmem:[%s3006_s10 + $0x10] sm:$0xff] %vm292_vm0, %v1338_v54  ;;  %v1335_v9 = vmul.f32 %v2423_v28, %v2838_v11  ;;  %v1696_v37 = vpop.xlane.xlu0 %1695 }
 0xd29   : > { %v2425_v13 = vpop.eup %2424 }
 0xd2a   : > { %v1337_v62 = vadd.f32 %v1335_v9, %v1191_v26  ;;  %v1611_v38 = vmul.f32 %v2425_v13, %v2925_v60  ;;  %v1693_v60 = vpop.xlane.xlu1 %1692 }
 0xd2b   : > { %v2427_v63 = vpop.eup %2426  ;;  %2430 = vrcp.f32 %v1693_v60 }
 0xd2c   : > { %v1339_v21 = vadd.f32 %v3001_v53, %v1337_v62  ;;  %v1613_v56 = vadd.f32 %v1611_v38, %v1467_v49  ;;  %v1468_v29 = vmul.f32 %v2427_v63, %v2879_v3  ;;  %2432 = vrcp.f32 %v1696_v37 }
 0xd2e   : > { %1341 = vst.msk [vmem:[%s3006_s10 + $0x18] sm:$0xff] %vm292_vm0, %v1339_v21  ;;  %v1615_v58 = vadd.f32 %v3001_v53, %v1613_v56 }
 0xd2f   : > { %v2429_v7 = vpop.eup %2428 }
 0xd30   : > { %1617 = vst.msk [vmem:[%s3006_s10 + $0x20] sm:$0xff] %vm292_vm0, %v1615_v58  ;;  %v1612_v11 = vmul.f32 %v2429_v7, %v2927_v61 }
 0xd32   : > { %v1614_v8 = vadd.f32 %v1612_v11, %v1468_v29 }
 0xd34   : > { %v1616_v1 = vadd.f32 %v3001_v53, %v1614_v8 }
 0xd35   : > { %v2431_v57 = vpop.eup %2430 }
 0xd36   : > { %1618 = vst.msk [vmem:[%s3006_s10 + $0x28] sm:$0xff] %vm292_vm0, %v1616_v1  ;;  %v2433_v20 = vpop.eup %2432  ;;  %v1744_v61 = vmul.f32 %v2431_v57, %v2950_v40 }
 0xd37   : > { %v1745_v19 = vmul.f32 %v2433_v20, %v2952_v47 }
 0xd73   : > { %v1825_v31 = vpop.xlane.xlu1 %1824 }
 0xd74   : > { %2434 = vrcp.f32 %v1825_v31 }
 0xd75   : > { %v1828_v33 = vpop.xlane.xlu0 %1827 }
 0xd76   : > { %2436 = vrcp.f32 %v1828_v33 }
 0xd7e   : > { %v2435_v3 = vpop.eup %2434 }
 0xd80   : > { %v2437_v22 = vpop.eup %2436 }
 0xdbc   : > { %v1881_v10 = vpop.f32.mrb[44].mxu0 }
 0xdbd   : > { %v1888_v12 = vmul.f32 %v2435_v3, %v1881_v10  ;;  %v2339_v18 = vpop.f32.mrb[45].mxu0 }
 0xdbe   : > { %v1884_v23 = vpop.f32.mrb[46].mxu0 }
 0xdbf   : > { %v1890_v15 = vadd.f32 %v1888_v12, %v1744_v61  ;;  %v1889_v24 = vmul.f32 %v2437_v22, %v1884_v23  ;;  %v2340_v17 = vpop.f32.mrb[47].mxu0 }
 0xdc1   : > { %v1892_v25 = vadd.f32 %v3001_v53, %v1890_v15  ;;  %v1891_v27 = vadd.f32 %v1889_v24, %v1745_v19 }
 0xdc3   : > { %1894 = vst.msk [vmem:[%s3006_s10 + $0x30] sm:$0xff] %vm292_vm0, %v1892_v25  ;;  %v1893_v32 = vadd.f32 %v3001_v53, %v1891_v27 }
 0xdc5   : > { %1895 = vst.msk [vmem:[%s3006_s10 + $0x38] sm:$0xff] %vm292_vm0, %v1893_v32 }
 0xdc6 PF: > { %s22_s26 = sadd.s32 1, %s2458_s26  }
 0xdc7   : > { %p19_p9 = scmp.ge.s32.totalorder %s22_s26, 4  }
 0xdc9   :  { %21 = sbr.rel (!%p19_p9) target bundleno = 16 (0x10), region = 86 }

</bundles_post_ra>
